<compile_context>
chip_gen: v5e
topology: v5e:2x2
jax: 0.10.0
libtpu: 0.0.40
codegen_flags: <defaults>
</compile_context>

<pallas_src>
import functools

import jax
import jax.numpy as jnp
from jax import lax
from jax.experimental import pallas as pl
from jax.experimental.pallas import tpu as pltpu


def _lstm_kernel(x_ref, h0_ref, c0_ref, wih0_ref, b0_ref, whh_ref,
                 wihr_ref, br_ref, wout_ref, bout_ref,
                 out_ref, hn_ref, cn_ref,
                 *, n_layers, hidden_dim):
    """Whole-sequence multi-layer LSTM + final Linear, single grid point.

    x_ref    : (T*B, D_in)          time-major, flattened input
    h0/c0    : (L, B, H)            initial hidden / cell state
    wih0_ref : (D_in, 4H)           layer-0 input weights (PyTorch gate order)
    b0_ref   : (1, 4H)              layer-0 combined bias (b_ih + b_hh)
    whh_ref  : (L, H, 4H)           hidden->gates weights, all layers
    wihr_ref : (max(L-1,1), H, 4H)  input->gates weights, layers 1..L-1
    br_ref   : (max(L-1,1), 1, 4H)  combined bias, layers 1..L-1
    wout_ref : (H, 1)               last column of the output Linear weight
    bout_ref : (1, 1)               last element of the output Linear bias
    out_ref  : (B, 1)               == output_layer(lstm_out).view(B,-1)[:, -1]
    hn/cn    : (L, B, H)            final hidden / cell state (aliased to h0/c0)
    """
    H = hidden_dim
    L = n_layers
    B = h0_ref.shape[1]
    TB = x_ref.shape[0]
    T = TB // B

    # --- running state -> vregs (read fully before the aliased outputs are
    #     ever written) -------------------------------------------------------
    hs = [h0_ref[l] for l in range(L)]
    cs = [c0_ref[l] for l in range(L)]

    # --- hoist weights / biases once; they stay resident across the loop -----
    whh = [whh_ref[l] for l in range(L)]
    wih_r = [wihr_ref[l - 1] for l in range(1, L)]
    b_r = [jnp.broadcast_to(br_ref[l - 1], (B, 4 * H)) for l in range(1, L)]

    # --- layer-0 input projection for ALL timesteps in ONE batched MXU call,
    #     with the combined layer-0 bias folded in (off the recurrence path) --
    xproj = (jnp.dot(x_ref[...], wih0_ref[...],
                     preferred_element_type=jnp.float32)
             + jnp.broadcast_to(b0_ref[...], (TB, 4 * H)))       # (T*B, 4H)

    def cell(pre_gates, h_prev, c_prev, w_hh):
        # no concat: the h @ W_hh matmul issues as soon as h_prev is ready
        gates = pre_gates + jnp.dot(h_prev, w_hh,
                                    preferred_element_type=jnp.float32)
        # full-vreg transcendentals; slice only at the cheap VPU combine.
        # PyTorch gate order: [i, f, g, o]
        sg = jax.nn.sigmoid(gates)
        th = jnp.tanh(gates)
        i_g = sg[:, 0 * H:1 * H]
        f_g = sg[:, 1 * H:2 * H]
        g_g = th[:, 2 * H:3 * H]
        o_g = sg[:, 3 * H:4 * H]
        c_new = f_g * c_prev + i_g * g_g
        h_new = o_g * jnp.tanh(c_new)
        return h_new, c_new

    # fully-unrolled static time loop (T, L small) -> cross-layer/step ILP.
    # TODO(synk): for large T switch to lax.fori_loop(unroll=2/4) + a VMEM
    # xproj scratch if the bundle dump ever shows vreg spills.
    for t in range(T):
        # layer 0: input contribution (+ bias) already precomputed
        hs[0], cs[0] = cell(xproj[t * B:(t + 1) * B, :], hs[0], cs[0], whh[0])
        inp = hs[0]
        for l in range(1, L):
            pre = (jnp.dot(inp, wih_r[l - 1],
                           preferred_element_type=jnp.float32) + b_r[l - 1])
            hs[l], cs[l] = cell(pre, hs[l], cs[l], whh[l])
            inp = hs[l]

    for l in range(L):
        hn_ref[l] = hs[l]
        cn_ref[l] = cs[l]

    # output head: only the single needed column of the Linear
    out_ref[...] = (jnp.dot(hs[L - 1], wout_ref[...],
                            preferred_element_type=jnp.float32)
                    + bout_ref[...])


def lstm_model_forward(x, hidden, params):
    """Mirrors Model.forward: returns (out, (h_n, c_n)); out has shape (B,)."""
    wih0, b0, whh_all, wih_rest, b_rest, wout_col, bout_col = params
    h0, c0 = hidden
    x = x.astype(jnp.float32)
    h0 = h0.astype(x.dtype)
    c0 = c0.astype(x.dtype)

    B, T, D = x.shape
    L, _, H = h0.shape

    # time-major then flatten: row t*B + b == x[b, t, :]
    x_2d = jnp.transpose(x, (1, 0, 2)).reshape(T * B, D)

    kernel = functools.partial(_lstm_kernel, n_layers=L, hidden_dim=H)
    vmem = pl.BlockSpec(memory_space=pltpu.MemorySpace.VMEM)

    out_last, h_n, c_n = pl.pallas_call(
        kernel,
        out_shape=(
            jax.ShapeDtypeStruct((B, 1), jnp.float32),
            jax.ShapeDtypeStruct((L, B, H), jnp.float32),
            jax.ShapeDtypeStruct((L, B, H), jnp.float32),
        ),
        in_specs=[vmem] * 10,
        out_specs=(vmem, vmem, vmem),
        # in-place state update: h0 -> h_n, c0 -> c_n
        input_output_aliases={1: 1, 2: 2},
        # TODO(synk): for large T/H/B (esp. v7x 64 MiB VMEM) add a time-chunk
        # grid with BlockSpecs for x and a "parallel" batch axis; unnecessary
        # at these shapes where everything fits in VMEM/vregs.
    )(x_2d, h0, c0, wih0, b0, whh_all, wih_rest, b_rest, wout_col, bout_col)

    return out_last[:, 0], (h_n, c_n)


def init_torch_params(key, input_dim, hidden_dim, output_dim, n_layers):
    """PyTorch-layout parameters, uniform(-1/sqrt(H), 1/sqrt(H)) like nn.LSTM."""
    H = hidden_dim
    k = 1.0 / jnp.sqrt(jnp.float32(H))
    keys = jax.random.split(key, 4 * n_layers + 2)

    def u(kk, shape):
        return jax.random.uniform(kk, shape, jnp.float32, -k, k)

    w_ih = [u(keys[l], (4 * H, input_dim if l == 0 else H))
            for l in range(n_layers)]
    w_hh = [u(keys[n_layers + l], (4 * H, H)) for l in range(n_layers)]
    b_ih = [u(keys[2 * n_layers + l], (4 * H,)) for l in range(n_layers)]
    b_hh = [u(keys[3 * n_layers + l], (4 * H,)) for l in range(n_layers)]
    w_out = u(keys[4 * n_layers], (output_dim, H))
    b_out = u(keys[4 * n_layers + 1], (output_dim,))
    return w_ih, w_hh, b_ih, b_hh, w_out, b_out


def pack_params(torch_params):
    """Glue (not hot path): transpose weights for row-major (B,K)@(K,4H)
    matmuls, keep W_ih / W_hh SEPARATE (no K-concat), combine biases,
    pre-slice the output head to its last column. PyTorch gate order kept."""
    w_ih, w_hh, b_ih, b_hh, w_out, b_out = torch_params
    L = len(w_ih)
    H = w_hh[0].shape[-1]

    wih0 = w_ih[0].T                                   # (D_in, 4H)
    b0 = (b_ih[0] + b_hh[0])[None, :]                  # (1, 4H)
    whh_all = jnp.stack([w_hh[l].T for l in range(L)])  # (L, H, 4H)
    if L > 1:
        wih_rest = jnp.stack([w_ih[l].T for l in range(1, L)])   # (L-1, H, 4H)
        b_rest = jnp.stack([(b_ih[l] + b_hh[l])[None, :]
                            for l in range(1, L)])               # (L-1, 1, 4H)
    else:
        wih_rest = jnp.zeros((1, H, 4 * H), jnp.float32)  # dummy, never read
        b_rest = jnp.zeros((1, 1, 4 * H), jnp.float32)    # dummy, never read
    # out.view(B, -1)[:, -1] only needs the LAST output feature of the head
    wout_col = w_out[-1:, :].T                         # (H, 1)
    bout_col = b_out[-1:][None, :]                     # (1, 1)
    return wih0, b0, whh_all, wih_rest, b_rest, wout_col, bout_col


def lstm_model_ref(x, hidden, torch_params):
    """Pure-JAX reference in PyTorch conventions (gate order i, f, g, o)."""
    w_ih, w_hh, b_ih, b_hh, w_out, b_out = torch_params
    h0, c0 = hidden
    x = x.astype(jnp.float32)
    L, _, H = h0.shape
    x_tbd = jnp.transpose(x, (1, 0, 2))

    def cell(carry, x_t):
        h, c = carry
        inp = x_t
        new_h, new_c = [], []
        for l in range(L):
            gates = inp @ w_ih[l].T + b_ih[l] + h[l] @ w_hh[l].T + b_hh[l]
            i_g = jax.nn.sigmoid(gates[:, 0 * H:1 * H])
            f_g = jax.nn.sigmoid(gates[:, 1 * H:2 * H])
            g_g = jnp.tanh(gates[:, 2 * H:3 * H])
            o_g = jax.nn.sigmoid(gates[:, 3 * H:4 * H])
            c_new = f_g * c[l] + i_g * g_g
            h_new = o_g * jnp.tanh(c_new)
            new_h.append(h_new)
            new_c.append(c_new)
            inp = h_new
        return (jnp.stack(new_h), jnp.stack(new_c)), inp

    (h_n, c_n), tops = lax.scan(cell, (h0, c0), x_tbd)
    out_full = tops[-1] @ w_out.T + b_out
    return out_full[:, -1], (h_n, c_n)


if __name__ == "__main__":
    # batch = 8 keeps every vreg sublane busy (per perf review) and keeps the
    # (T*B, D) time-major rows aligned to full 8-row sublane tiles.
    batch = 8
    seq_len = 8
    input_dim = 16
    hidden_dim = 32
    output_dim = 4
    n_layers = 2

    key = jax.random.PRNGKey(0)
    kx, kp = jax.random.split(key)

    x = jax.random.normal(kx, (batch, seq_len, input_dim), jnp.float32)
    # init_hidden: zero hidden / cell state
    h0 = jnp.zeros((n_layers, batch, hidden_dim), jnp.float32)
    c0 = jnp.zeros((n_layers, batch, hidden_dim), jnp.float32)

    torch_params = init_torch_params(kp, input_dim, hidden_dim, output_dim,
                                     n_layers)
    params = pack_params(torch_params)

    out, (h_n, c_n) = lstm_model_forward(x, (h0, c0), params)
    jax.block_until_ready((out, h_n, c_n))

    out_r, (h_r, c_r) = lstm_model_ref(x, (h0, c0), torch_params)
    assert out.shape == (batch,)
    assert h_n.shape == (n_layers, batch, hidden_dim)
    assert c_n.shape == (n_layers, batch, hidden_dim)
    assert jnp.allclose(out, out_r, atol=1e-4, rtol=1e-4)
    assert jnp.allclose(h_n, h_r, atol=1e-4, rtol=1e-4)
    assert jnp.allclose(c_n, c_r, atol=1e-4, rtol=1e-4)

    print("KERNEL_OK")
</pallas_src>

<mosaic_0001>
module attributes {stable_mosaic.version = 11 : i64} {
  func.func @_lstm_kernel(%arg0: memref<64x16xf32, #tpu.memory_space<vmem>>, %arg1: memref<2x8x32xf32, #tpu.memory_space<vmem>>, %arg2: memref<2x8x32xf32, #tpu.memory_space<vmem>>, %arg3: memref<16x128xf32, #tpu.memory_space<vmem>>, %arg4: memref<1x128xf32, #tpu.memory_space<vmem>>, %arg5: memref<2x32x128xf32, #tpu.memory_space<vmem>>, %arg6: memref<1x32x128xf32, #tpu.memory_space<vmem>>, %arg7: memref<1x1x128xf32, #tpu.memory_space<vmem>>, %arg8: memref<32x1xf32, #tpu.memory_space<vmem>>, %arg9: memref<1x1xf32, #tpu.memory_space<vmem>>, %arg10: memref<8x1xf32, #tpu.memory_space<vmem>>, %arg11: memref<2x8x32xf32, #tpu.memory_space<vmem>>, %arg12: memref<2x8x32xf32, #tpu.memory_space<vmem>>) attributes {dimension_semantics = [], scalar_prefetch = 0 : i64, scratch_operands = 0 : i64, tpu.core_type = #tpu.core_type<tc>} {
    %c0 = arith.constant 0 : index
    %c0_0 = arith.constant 0 : index
    %c0_1 = arith.constant 0 : index
    %0 = vector.load %arg1[%c0, %c0_0, %c0_1] : memref<2x8x32xf32, #tpu.memory_space<vmem>>, vector<1x8x32xf32>
    %1 = vector.shape_cast %0 : vector<1x8x32xf32> to vector<8x32xf32>
    %c1 = arith.constant 1 : index
    %c0_2 = arith.constant 0 : index
    %c0_3 = arith.constant 0 : index
    %2 = vector.load %arg1[%c1, %c0_2, %c0_3] : memref<2x8x32xf32, #tpu.memory_space<vmem>>, vector<1x8x32xf32>
    %3 = vector.shape_cast %2 : vector<1x8x32xf32> to vector<8x32xf32>
    %c0_4 = arith.constant 0 : index
    %c0_5 = arith.constant 0 : index
    %c0_6 = arith.constant 0 : index
    %4 = vector.load %arg2[%c0_4, %c0_5, %c0_6] : memref<2x8x32xf32, #tpu.memory_space<vmem>>, vector<1x8x32xf32>
    %5 = vector.shape_cast %4 : vector<1x8x32xf32> to vector<8x32xf32>
    %c1_7 = arith.constant 1 : index
    %c0_8 = arith.constant 0 : index
    %c0_9 = arith.constant 0 : index
    %6 = vector.load %arg2[%c1_7, %c0_8, %c0_9] : memref<2x8x32xf32, #tpu.memory_space<vmem>>, vector<1x8x32xf32>
    %7 = vector.shape_cast %6 : vector<1x8x32xf32> to vector<8x32xf32>
    %c0_10 = arith.constant 0 : index
    %c0_11 = arith.constant 0 : index
    %c0_12 = arith.constant 0 : index
    %8 = vector.load %arg5[%c0_10, %c0_11, %c0_12] : memref<2x32x128xf32, #tpu.memory_space<vmem>>, vector<1x32x128xf32>
    %9 = vector.shape_cast %8 : vector<1x32x128xf32> to vector<32x128xf32>
    %c1_13 = arith.constant 1 : index
    %c0_14 = arith.constant 0 : index
    %c0_15 = arith.constant 0 : index
    %10 = vector.load %arg5[%c1_13, %c0_14, %c0_15] : memref<2x32x128xf32, #tpu.memory_space<vmem>>, vector<1x32x128xf32>
    %11 = vector.shape_cast %10 : vector<1x32x128xf32> to vector<32x128xf32>
    %c0_16 = arith.constant 0 : index
    %c0_17 = arith.constant 0 : index
    %c0_18 = arith.constant 0 : index
    %12 = vector.load %arg6[%c0_16, %c0_17, %c0_18] : memref<1x32x128xf32, #tpu.memory_space<vmem>>, vector<1x32x128xf32>
    %13 = vector.shape_cast %12 : vector<1x32x128xf32> to vector<32x128xf32>
    %c0_19 = arith.constant 0 : index
    %c0_20 = arith.constant 0 : index
    %c0_21 = arith.constant 0 : index
    %14 = vector.load %arg7[%c0_19, %c0_20, %c0_21] : memref<1x1x128xf32, #tpu.memory_space<vmem>>, vector<1x1x128xf32>
    %15 = vector.shape_cast %14 : vector<1x1x128xf32> to vector<1x128xf32>
    %16 = vector.shape_cast %15 : vector<1x128xf32> to vector<1x128xf32>
    %17 = vector.broadcast %16 : vector<1x128xf32> to vector<8x128xf32>
    %c0_22 = arith.constant 0 : index
    %c0_23 = arith.constant 0 : index
    %18 = vector.load %arg0[%c0_22, %c0_23] : memref<64x16xf32, #tpu.memory_space<vmem>>, vector<64x16xf32>
    %c0_24 = arith.constant 0 : index
    %c0_25 = arith.constant 0 : index
    %19 = vector.load %arg3[%c0_24, %c0_25] : memref<16x128xf32, #tpu.memory_space<vmem>>, vector<16x128xf32>
    %cst = arith.constant dense<0.000000e+00> : vector<64x128xf32>
    %20 = tpu.matmul %18, %19, %cst {dimension_numbers = #tpu.dot_dimension_numbers<[1], [0], [0], [1], [0, 0, 1, 1], [], []>} : vector<64x16xf32>, vector<16x128xf32>, vector<64x128xf32> -> vector<64x128xf32>
    %c0_26 = arith.constant 0 : index
    %c0_27 = arith.constant 0 : index
    %21 = vector.load %arg4[%c0_26, %c0_27] : memref<1x128xf32, #tpu.memory_space<vmem>>, vector<1x128xf32>
    %22 = vector.shape_cast %21 : vector<1x128xf32> to vector<1x128xf32>
    %23 = vector.broadcast %22 : vector<1x128xf32> to vector<64x128xf32>
    %24 = arith.addf %20, %23 : vector<64x128xf32>
    %25 = vector.extract_strided_slice %24 {offsets = [0, 0], sizes = [8, 128], strides = [1, 1]} : vector<64x128xf32> to vector<8x128xf32>
    %cst_28 = arith.constant dense<0.000000e+00> : vector<8x128xf32>
    %26 = tpu.matmul %1, %9, %cst_28 {dimension_numbers = #tpu.dot_dimension_numbers<[1], [0], [0], [1], [0, 0, 1, 1], [], []>} : vector<8x32xf32>, vector<32x128xf32>, vector<8x128xf32> -> vector<8x128xf32>
    %27 = arith.addf %25, %26 : vector<8x128xf32>
    %28 = arith.negf %27 : vector<8x128xf32>
    %29 = math.exp %28 : vector<8x128xf32>
    %cst_29 = arith.constant 1.000000e+00 : f32
    %30 = vector.broadcast %cst_29 : f32 to vector<8x128xf32>
    %31 = arith.addf %30, %29 : vector<8x128xf32>
    %32 = arith.divf %30, %31 : vector<8x128xf32>
    %33 = math.tanh %27 : vector<8x128xf32>
    %34 = vector.extract_strided_slice %32 {offsets = [0, 0], sizes = [8, 32], strides = [1, 1]} : vector<8x128xf32> to vector<8x32xf32>
    %35 = vector.extract_strided_slice %32 {offsets = [0, 32], sizes = [8, 32], strides = [1, 1]} : vector<8x128xf32> to vector<8x32xf32>
    %36 = vector.extract_strided_slice %33 {offsets = [0, 64], sizes = [8, 32], strides = [1, 1]} : vector<8x128xf32> to vector<8x32xf32>
    %37 = vector.extract_strided_slice %32 {offsets = [0, 96], sizes = [8, 32], strides = [1, 1]} : vector<8x128xf32> to vector<8x32xf32>
    %38 = arith.mulf %35, %5 : vector<8x32xf32>
    %39 = arith.mulf %34, %36 : vector<8x32xf32>
    %40 = arith.addf %38, %39 : vector<8x32xf32>
    %41 = math.tanh %40 : vector<8x32xf32>
    %42 = arith.mulf %37, %41 : vector<8x32xf32>
    %cst_30 = arith.constant dense<0.000000e+00> : vector<8x128xf32>
    %43 = tpu.matmul %42, %13, %cst_30 {dimension_numbers = #tpu.dot_dimension_numbers<[1], [0], [0], [1], [0, 0, 1, 1], [], []>} : vector<8x32xf32>, vector<32x128xf32>, vector<8x128xf32> -> vector<8x128xf32>
    %44 = arith.addf %43, %17 : vector<8x128xf32>
    %cst_31 = arith.constant dense<0.000000e+00> : vector<8x128xf32>
    %45 = tpu.matmul %3, %11, %cst_31 {dimension_numbers = #tpu.dot_dimension_numbers<[1], [0], [0], [1], [0, 0, 1, 1], [], []>} : vector<8x32xf32>, vector<32x128xf32>, vector<8x128xf32> -> vector<8x128xf32>
    %46 = arith.addf %44, %45 : vector<8x128xf32>
    %47 = arith.negf %46 : vector<8x128xf32>
    %48 = math.exp %47 : vector<8x128xf32>
    %cst_32 = arith.constant 1.000000e+00 : f32
    %49 = vector.broadcast %cst_32 : f32 to vector<8x128xf32>
    %50 = arith.addf %49, %48 : vector<8x128xf32>
    %51 = arith.divf %49, %50 : vector<8x128xf32>
    %52 = math.tanh %46 : vector<8x128xf32>
    %53 = vector.extract_strided_slice %51 {offsets = [0, 0], sizes = [8, 32], strides = [1, 1]} : vector<8x128xf32> to vector<8x32xf32>
    %54 = vector.extract_strided_slice %51 {offsets = [0, 32], sizes = [8, 32], strides = [1, 1]} : vector<8x128xf32> to vector<8x32xf32>
    %55 = vector.extract_strided_slice %52 {offsets = [0, 64], sizes = [8, 32], strides = [1, 1]} : vector<8x128xf32> to vector<8x32xf32>
    %56 = vector.extract_strided_slice %51 {offsets = [0, 96], sizes = [8, 32], strides = [1, 1]} : vector<8x128xf32> to vector<8x32xf32>
    %57 = arith.mulf %54, %7 : vector<8x32xf32>
    %58 = arith.mulf %53, %55 : vector<8x32xf32>
    %59 = arith.addf %57, %58 : vector<8x32xf32>
    %60 = math.tanh %59 : vector<8x32xf32>
    %61 = arith.mulf %56, %60 : vector<8x32xf32>
    %62 = vector.extract_strided_slice %24 {offsets = [8, 0], sizes = [8, 128], strides = [1, 1]} : vector<64x128xf32> to vector<8x128xf32>
    %cst_33 = arith.constant dense<0.000000e+00> : vector<8x128xf32>
    %63 = tpu.matmul %42, %9, %cst_33 {dimension_numbers = #tpu.dot_dimension_numbers<[1], [0], [0], [1], [0, 0, 1, 1], [], []>} : vector<8x32xf32>, vector<32x128xf32>, vector<8x128xf32> -> vector<8x128xf32>
    %64 = arith.addf %62, %63 : vector<8x128xf32>
    %65 = arith.negf %64 : vector<8x128xf32>
    %66 = math.exp %65 : vector<8x128xf32>
    %cst_34 = arith.constant 1.000000e+00 : f32
    %67 = vector.broadcast %cst_34 : f32 to vector<8x128xf32>
    %68 = arith.addf %67, %66 : vector<8x128xf32>
    %69 = arith.divf %67, %68 : vector<8x128xf32>
    %70 = math.tanh %64 : vector<8x128xf32>
    %71 = vector.extract_strided_slice %69 {offsets = [0, 0], sizes = [8, 32], strides = [1, 1]} : vector<8x128xf32> to vector<8x32xf32>
    %72 = vector.extract_strided_slice %69 {offsets = [0, 32], sizes = [8, 32], strides = [1, 1]} : vector<8x128xf32> to vector<8x32xf32>
    %73 = vector.extract_strided_slice %70 {offsets = [0, 64], sizes = [8, 32], strides = [1, 1]} : vector<8x128xf32> to vector<8x32xf32>
    %74 = vector.extract_strided_slice %69 {offsets = [0, 96], sizes = [8, 32], strides = [1, 1]} : vector<8x128xf32> to vector<8x32xf32>
    %75 = arith.mulf %72, %40 : vector<8x32xf32>
    %76 = arith.mulf %71, %73 : vector<8x32xf32>
    %77 = arith.addf %75, %76 : vector<8x32xf32>
    %78 = math.tanh %77 : vector<8x32xf32>
    %79 = arith.mulf %74, %78 : vector<8x32xf32>
    %cst_35 = arith.constant dense<0.000000e+00> : vector<8x128xf32>
    %80 = tpu.matmul %79, %13, %cst_35 {dimension_numbers = #tpu.dot_dimension_numbers<[1], [0], [0], [1], [0, 0, 1, 1], [], []>} : vector<8x32xf32>, vector<32x128xf32>, vector<8x128xf32> -> vector<8x128xf32>
    %81 = arith.addf %80, %17 : vector<8x128xf32>
    %cst_36 = arith.constant dense<0.000000e+00> : vector<8x128xf32>
    %82 = tpu.matmul %61, %11, %cst_36 {dimension_numbers = #tpu.dot_dimension_numbers<[1], [0], [0], [1], [0, 0, 1, 1], [], []>} : vector<8x32xf32>, vector<32x128xf32>, vector<8x128xf32> -> vector<8x128xf32>
    %83 = arith.addf %81, %82 : vector<8x128xf32>
    %84 = arith.negf %83 : vector<8x128xf32>
    %85 = math.exp %84 : vector<8x128xf32>
    %cst_37 = arith.constant 1.000000e+00 : f32
    %86 = vector.broadcast %cst_37 : f32 to vector<8x128xf32>
    %87 = arith.addf %86, %85 : vector<8x128xf32>
    %88 = arith.divf %86, %87 : vector<8x128xf32>
    %89 = math.tanh %83 : vector<8x128xf32>
    %90 = vector.extract_strided_slice %88 {offsets = [0, 0], sizes = [8, 32], strides = [1, 1]} : vector<8x128xf32> to vector<8x32xf32>
    %91 = vector.extract_strided_slice %88 {offsets = [0, 32], sizes = [8, 32], strides = [1, 1]} : vector<8x128xf32> to vector<8x32xf32>
    %92 = vector.extract_strided_slice %89 {offsets = [0, 64], sizes = [8, 32], strides = [1, 1]} : vector<8x128xf32> to vector<8x32xf32>
    %93 = vector.extract_strided_slice %88 {offsets = [0, 96], sizes = [8, 32], strides = [1, 1]} : vector<8x128xf32> to vector<8x32xf32>
    %94 = arith.mulf %91, %59 : vector<8x32xf32>
    %95 = arith.mulf %90, %92 : vector<8x32xf32>
    %96 = arith.addf %94, %95 : vector<8x32xf32>
    %97 = math.tanh %96 : vector<8x32xf32>
    %98 = arith.mulf %93, %97 : vector<8x32xf32>
    %99 = vector.extract_strided_slice %24 {offsets = [16, 0], sizes = [8, 128], strides = [1, 1]} : vector<64x128xf32> to vector<8x128xf32>
    %cst_38 = arith.constant dense<0.000000e+00> : vector<8x128xf32>
    %100 = tpu.matmul %79, %9, %cst_38 {dimension_numbers = #tpu.dot_dimension_numbers<[1], [0], [0], [1], [0, 0, 1, 1], [], []>} : vector<8x32xf32>, vector<32x128xf32>, vector<8x128xf32> -> vector<8x128xf32>
    %101 = arith.addf %99, %100 : vector<8x128xf32>
    %102 = arith.negf %101 : vector<8x128xf32>
    %103 = math.exp %102 : vector<8x128xf32>
    %cst_39 = arith.constant 1.000000e+00 : f32
    %104 = vector.broadcast %cst_39 : f32 to vector<8x128xf32>
    %105 = arith.addf %104, %103 : vector<8x128xf32>
    %106 = arith.divf %104, %105 : vector<8x128xf32>
    %107 = math.tanh %101 : vector<8x128xf32>
    %108 = vector.extract_strided_slice %106 {offsets = [0, 0], sizes = [8, 32], strides = [1, 1]} : vector<8x128xf32> to vector<8x32xf32>
    %109 = vector.extract_strided_slice %106 {offsets = [0, 32], sizes = [8, 32], strides = [1, 1]} : vector<8x128xf32> to vector<8x32xf32>
    %110 = vector.extract_strided_slice %107 {offsets = [0, 64], sizes = [8, 32], strides = [1, 1]} : vector<8x128xf32> to vector<8x32xf32>
    %111 = vector.extract_strided_slice %106 {offsets = [0, 96], sizes = [8, 32], strides = [1, 1]} : vector<8x128xf32> to vector<8x32xf32>
    %112 = arith.mulf %109, %77 : vector<8x32xf32>
    %113 = arith.mulf %108, %110 : vector<8x32xf32>
    %114 = arith.addf %112, %113 : vector<8x32xf32>
    %115 = math.tanh %114 : vector<8x32xf32>
    %116 = arith.mulf %111, %115 : vector<8x32xf32>
    %cst_40 = arith.constant dense<0.000000e+00> : vector<8x128xf32>
    %117 = tpu.matmul %116, %13, %cst_40 {dimension_numbers = #tpu.dot_dimension_numbers<[1], [0], [0], [1], [0, 0, 1, 1], [], []>} : vector<8x32xf32>, vector<32x128xf32>, vector<8x128xf32> -> vector<8x128xf32>
    %118 = arith.addf %117, %17 : vector<8x128xf32>
    %cst_41 = arith.constant dense<0.000000e+00> : vector<8x128xf32>
    %119 = tpu.matmul %98, %11, %cst_41 {dimension_numbers = #tpu.dot_dimension_numbers<[1], [0], [0], [1], [0, 0, 1, 1], [], []>} : vector<8x32xf32>, vector<32x128xf32>, vector<8x128xf32> -> vector<8x128xf32>
    %120 = arith.addf %118, %119 : vector<8x128xf32>
    %121 = arith.negf %120 : vector<8x128xf32>
    %122 = math.exp %121 : vector<8x128xf32>
    %cst_42 = arith.constant 1.000000e+00 : f32
    %123 = vector.broadcast %cst_42 : f32 to vector<8x128xf32>
    %124 = arith.addf %123, %122 : vector<8x128xf32>
    %125 = arith.divf %123, %124 : vector<8x128xf32>
    %126 = math.tanh %120 : vector<8x128xf32>
    %127 = vector.extract_strided_slice %125 {offsets = [0, 0], sizes = [8, 32], strides = [1, 1]} : vector<8x128xf32> to vector<8x32xf32>
    %128 = vector.extract_strided_slice %125 {offsets = [0, 32], sizes = [8, 32], strides = [1, 1]} : vector<8x128xf32> to vector<8x32xf32>
    %129 = vector.extract_strided_slice %126 {offsets = [0, 64], sizes = [8, 32], strides = [1, 1]} : vector<8x128xf32> to vector<8x32xf32>
    %130 = vector.extract_strided_slice %125 {offsets = [0, 96], sizes = [8, 32], strides = [1, 1]} : vector<8x128xf32> to vector<8x32xf32>
    %131 = arith.mulf %128, %96 : vector<8x32xf32>
    %132 = arith.mulf %127, %129 : vector<8x32xf32>
    %133 = arith.addf %131, %132 : vector<8x32xf32>
    %134 = math.tanh %133 : vector<8x32xf32>
    %135 = arith.mulf %130, %134 : vector<8x32xf32>
    %136 = vector.extract_strided_slice %24 {offsets = [24, 0], sizes = [8, 128], strides = [1, 1]} : vector<64x128xf32> to vector<8x128xf32>
    %cst_43 = arith.constant dense<0.000000e+00> : vector<8x128xf32>
    %137 = tpu.matmul %116, %9, %cst_43 {dimension_numbers = #tpu.dot_dimension_numbers<[1], [0], [0], [1], [0, 0, 1, 1], [], []>} : vector<8x32xf32>, vector<32x128xf32>, vector<8x128xf32> -> vector<8x128xf32>
    %138 = arith.addf %136, %137 : vector<8x128xf32>
    %139 = arith.negf %138 : vector<8x128xf32>
    %140 = math.exp %139 : vector<8x128xf32>
    %cst_44 = arith.constant 1.000000e+00 : f32
    %141 = vector.broadcast %cst_44 : f32 to vector<8x128xf32>
    %142 = arith.addf %141, %140 : vector<8x128xf32>
    %143 = arith.divf %141, %142 : vector<8x128xf32>
    %144 = math.tanh %138 : vector<8x128xf32>
    %145 = vector.extract_strided_slice %143 {offsets = [0, 0], sizes = [8, 32], strides = [1, 1]} : vector<8x128xf32> to vector<8x32xf32>
    %146 = vector.extract_strided_slice %143 {offsets = [0, 32], sizes = [8, 32], strides = [1, 1]} : vector<8x128xf32> to vector<8x32xf32>
    %147 = vector.extract_strided_slice %144 {offsets = [0, 64], sizes = [8, 32], strides = [1, 1]} : vector<8x128xf32> to vector<8x32xf32>
    %148 = vector.extract_strided_slice %143 {offsets = [0, 96], sizes = [8, 32], strides = [1, 1]} : vector<8x128xf32> to vector<8x32xf32>
    %149 = arith.mulf %146, %114 : vector<8x32xf32>
    %150 = arith.mulf %145, %147 : vector<8x32xf32>
    %151 = arith.addf %149, %150 : vector<8x32xf32>
    %152 = math.tanh %151 : vector<8x32xf32>
    %153 = arith.mulf %148, %152 : vector<8x32xf32>
    %cst_45 = arith.constant dense<0.000000e+00> : vector<8x128xf32>
    %154 = tpu.matmul %153, %13, %cst_45 {dimension_numbers = #tpu.dot_dimension_numbers<[1], [0], [0], [1], [0, 0, 1, 1], [], []>} : vector<8x32xf32>, vector<32x128xf32>, vector<8x128xf32> -> vector<8x128xf32>
    %155 = arith.addf %154, %17 : vector<8x128xf32>
    %cst_46 = arith.constant dense<0.000000e+00> : vector<8x128xf32>
    %156 = tpu.matmul %135, %11, %cst_46 {dimension_numbers = #tpu.dot_dimension_numbers<[1], [0], [0], [1], [0, 0, 1, 1], [], []>} : vector<8x32xf32>, vector<32x128xf32>, vector<8x128xf32> -> vector<8x128xf32>
    %157 = arith.addf %155, %156 : vector<8x128xf32>
    %158 = arith.negf %157 : vector<8x128xf32>
    %159 = math.exp %158 : vector<8x128xf32>
    %cst_47 = arith.constant 1.000000e+00 : f32
    %160 = vector.broadcast %cst_47 : f32 to vector<8x128xf32>
    %161 = arith.addf %160, %159 : vector<8x128xf32>
    %162 = arith.divf %160, %161 : vector<8x128xf32>
    %163 = math.tanh %157 : vector<8x128xf32>
    %164 = vector.extract_strided_slice %162 {offsets = [0, 0], sizes = [8, 32], strides = [1, 1]} : vector<8x128xf32> to vector<8x32xf32>
    %165 = vector.extract_strided_slice %162 {offsets = [0, 32], sizes = [8, 32], strides = [1, 1]} : vector<8x128xf32> to vector<8x32xf32>
    %166 = vector.extract_strided_slice %163 {offsets = [0, 64], sizes = [8, 32], strides = [1, 1]} : vector<8x128xf32> to vector<8x32xf32>
    %167 = vector.extract_strided_slice %162 {offsets = [0, 96], sizes = [8, 32], strides = [1, 1]} : vector<8x128xf32> to vector<8x32xf32>
    %168 = arith.mulf %165, %133 : vector<8x32xf32>
    %169 = arith.mulf %164, %166 : vector<8x32xf32>
    %170 = arith.addf %168, %169 : vector<8x32xf32>
    %171 = math.tanh %170 : vector<8x32xf32>
    %172 = arith.mulf %167, %171 : vector<8x32xf32>
    %173 = vector.extract_strided_slice %24 {offsets = [32, 0], sizes = [8, 128], strides = [1, 1]} : vector<64x128xf32> to vector<8x128xf32>
    %cst_48 = arith.constant dense<0.000000e+00> : vector<8x128xf32>
    %174 = tpu.matmul %153, %9, %cst_48 {dimension_numbers = #tpu.dot_dimension_numbers<[1], [0], [0], [1], [0, 0, 1, 1], [], []>} : vector<8x32xf32>, vector<32x128xf32>, vector<8x128xf32> -> vector<8x128xf32>
    %175 = arith.addf %173, %174 : vector<8x128xf32>
    %176 = arith.negf %175 : vector<8x128xf32>
    %177 = math.exp %176 : vector<8x128xf32>
    %cst_49 = arith.constant 1.000000e+00 : f32
    %178 = vector.broadcast %cst_49 : f32 to vector<8x128xf32>
    %179 = arith.addf %178, %177 : vector<8x128xf32>
    %180 = arith.divf %178, %179 : vector<8x128xf32>
    %181 = math.tanh %175 : vector<8x128xf32>
    %182 = vector.extract_strided_slice %180 {offsets = [0, 0], sizes = [8, 32], strides = [1, 1]} : vector<8x128xf32> to vector<8x32xf32>
    %183 = vector.extract_strided_slice %180 {offsets = [0, 32], sizes = [8, 32], strides = [1, 1]} : vector<8x128xf32> to vector<8x32xf32>
    %184 = vector.extract_strided_slice %181 {offsets = [0, 64], sizes = [8, 32], strides = [1, 1]} : vector<8x128xf32> to vector<8x32xf32>
    %185 = vector.extract_strided_slice %180 {offsets = [0, 96], sizes = [8, 32], strides = [1, 1]} : vector<8x128xf32> to vector<8x32xf32>
    %186 = arith.mulf %183, %151 : vector<8x32xf32>
    %187 = arith.mulf %182, %184 : vector<8x32xf32>
    %188 = arith.addf %186, %187 : vector<8x32xf32>
    %189 = math.tanh %188 : vector<8x32xf32>
    %190 = arith.mulf %185, %189 : vector<8x32xf32>
    %cst_50 = arith.constant dense<0.000000e+00> : vector<8x128xf32>
    %191 = tpu.matmul %190, %13, %cst_50 {dimension_numbers = #tpu.dot_dimension_numbers<[1], [0], [0], [1], [0, 0, 1, 1], [], []>} : vector<8x32xf32>, vector<32x128xf32>, vector<8x128xf32> -> vector<8x128xf32>
    %192 = arith.addf %191, %17 : vector<8x128xf32>
    %cst_51 = arith.constant dense<0.000000e+00> : vector<8x128xf32>
    %193 = tpu.matmul %172, %11, %cst_51 {dimension_numbers = #tpu.dot_dimension_numbers<[1], [0], [0], [1], [0, 0, 1, 1], [], []>} : vector<8x32xf32>, vector<32x128xf32>, vector<8x128xf32> -> vector<8x128xf32>
    %194 = arith.addf %192, %193 : vector<8x128xf32>
    %195 = arith.negf %194 : vector<8x128xf32>
    %196 = math.exp %195 : vector<8x128xf32>
    %cst_52 = arith.constant 1.000000e+00 : f32
    %197 = vector.broadcast %cst_52 : f32 to vector<8x128xf32>
    %198 = arith.addf %197, %196 : vector<8x128xf32>
    %199 = arith.divf %197, %198 : vector<8x128xf32>
    %200 = math.tanh %194 : vector<8x128xf32>
    %201 = vector.extract_strided_slice %199 {offsets = [0, 0], sizes = [8, 32], strides = [1, 1]} : vector<8x128xf32> to vector<8x32xf32>
    %202 = vector.extract_strided_slice %199 {offsets = [0, 32], sizes = [8, 32], strides = [1, 1]} : vector<8x128xf32> to vector<8x32xf32>
    %203 = vector.extract_strided_slice %200 {offsets = [0, 64], sizes = [8, 32], strides = [1, 1]} : vector<8x128xf32> to vector<8x32xf32>
    %204 = vector.extract_strided_slice %199 {offsets = [0, 96], sizes = [8, 32], strides = [1, 1]} : vector<8x128xf32> to vector<8x32xf32>
    %205 = arith.mulf %202, %170 : vector<8x32xf32>
    %206 = arith.mulf %201, %203 : vector<8x32xf32>
    %207 = arith.addf %205, %206 : vector<8x32xf32>
    %208 = math.tanh %207 : vector<8x32xf32>
    %209 = arith.mulf %204, %208 : vector<8x32xf32>
    %210 = vector.extract_strided_slice %24 {offsets = [40, 0], sizes = [8, 128], strides = [1, 1]} : vector<64x128xf32> to vector<8x128xf32>
    %cst_53 = arith.constant dense<0.000000e+00> : vector<8x128xf32>
    %211 = tpu.matmul %190, %9, %cst_53 {dimension_numbers = #tpu.dot_dimension_numbers<[1], [0], [0], [1], [0, 0, 1, 1], [], []>} : vector<8x32xf32>, vector<32x128xf32>, vector<8x128xf32> -> vector<8x128xf32>
    %212 = arith.addf %210, %211 : vector<8x128xf32>
    %213 = arith.negf %212 : vector<8x128xf32>
    %214 = math.exp %213 : vector<8x128xf32>
    %cst_54 = arith.constant 1.000000e+00 : f32
    %215 = vector.broadcast %cst_54 : f32 to vector<8x128xf32>
    %216 = arith.addf %215, %214 : vector<8x128xf32>
    %217 = arith.divf %215, %216 : vector<8x128xf32>
    %218 = math.tanh %212 : vector<8x128xf32>
    %219 = vector.extract_strided_slice %217 {offsets = [0, 0], sizes = [8, 32], strides = [1, 1]} : vector<8x128xf32> to vector<8x32xf32>
    %220 = vector.extract_strided_slice %217 {offsets = [0, 32], sizes = [8, 32], strides = [1, 1]} : vector<8x128xf32> to vector<8x32xf32>
    %221 = vector.extract_strided_slice %218 {offsets = [0, 64], sizes = [8, 32], strides = [1, 1]} : vector<8x128xf32> to vector<8x32xf32>
    %222 = vector.extract_strided_slice %217 {offsets = [0, 96], sizes = [8, 32], strides = [1, 1]} : vector<8x128xf32> to vector<8x32xf32>
    %223 = arith.mulf %220, %188 : vector<8x32xf32>
    %224 = arith.mulf %219, %221 : vector<8x32xf32>
    %225 = arith.addf %223, %224 : vector<8x32xf32>
    %226 = math.tanh %225 : vector<8x32xf32>
    %227 = arith.mulf %222, %226 : vector<8x32xf32>
    %cst_55 = arith.constant dense<0.000000e+00> : vector<8x128xf32>
    %228 = tpu.matmul %227, %13, %cst_55 {dimension_numbers = #tpu.dot_dimension_numbers<[1], [0], [0], [1], [0, 0, 1, 1], [], []>} : vector<8x32xf32>, vector<32x128xf32>, vector<8x128xf32> -> vector<8x128xf32>
    %229 = arith.addf %228, %17 : vector<8x128xf32>
    %cst_56 = arith.constant dense<0.000000e+00> : vector<8x128xf32>
    %230 = tpu.matmul %209, %11, %cst_56 {dimension_numbers = #tpu.dot_dimension_numbers<[1], [0], [0], [1], [0, 0, 1, 1], [], []>} : vector<8x32xf32>, vector<32x128xf32>, vector<8x128xf32> -> vector<8x128xf32>
    %231 = arith.addf %229, %230 : vector<8x128xf32>
    %232 = arith.negf %231 : vector<8x128xf32>
    %233 = math.exp %232 : vector<8x128xf32>
    %cst_57 = arith.constant 1.000000e+00 : f32
    %234 = vector.broadcast %cst_57 : f32 to vector<8x128xf32>
    %235 = arith.addf %234, %233 : vector<8x128xf32>
    %236 = arith.divf %234, %235 : vector<8x128xf32>
    %237 = math.tanh %231 : vector<8x128xf32>
    %238 = vector.extract_strided_slice %236 {offsets = [0, 0], sizes = [8, 32], strides = [1, 1]} : vector<8x128xf32> to vector<8x32xf32>
    %239 = vector.extract_strided_slice %236 {offsets = [0, 32], sizes = [8, 32], strides = [1, 1]} : vector<8x128xf32> to vector<8x32xf32>
    %240 = vector.extract_strided_slice %237 {offsets = [0, 64], sizes = [8, 32], strides = [1, 1]} : vector<8x128xf32> to vector<8x32xf32>
    %241 = vector.extract_strided_slice %236 {offsets = [0, 96], sizes = [8, 32], strides = [1, 1]} : vector<8x128xf32> to vector<8x32xf32>
    %242 = arith.mulf %239, %207 : vector<8x32xf32>
    %243 = arith.mulf %238, %240 : vector<8x32xf32>
    %244 = arith.addf %242, %243 : vector<8x32xf32>
    %245 = math.tanh %244 : vector<8x32xf32>
    %246 = arith.mulf %241, %245 : vector<8x32xf32>
    %247 = vector.extract_strided_slice %24 {offsets = [48, 0], sizes = [8, 128], strides = [1, 1]} : vector<64x128xf32> to vector<8x128xf32>
    %cst_58 = arith.constant dense<0.000000e+00> : vector<8x128xf32>
    %248 = tpu.matmul %227, %9, %cst_58 {dimension_numbers = #tpu.dot_dimension_numbers<[1], [0], [0], [1], [0, 0, 1, 1], [], []>} : vector<8x32xf32>, vector<32x128xf32>, vector<8x128xf32> -> vector<8x128xf32>
    %249 = arith.addf %247, %248 : vector<8x128xf32>
    %250 = arith.negf %249 : vector<8x128xf32>
    %251 = math.exp %250 : vector<8x128xf32>
    %cst_59 = arith.constant 1.000000e+00 : f32
    %252 = vector.broadcast %cst_59 : f32 to vector<8x128xf32>
    %253 = arith.addf %252, %251 : vector<8x128xf32>
    %254 = arith.divf %252, %253 : vector<8x128xf32>
    %255 = math.tanh %249 : vector<8x128xf32>
    %256 = vector.extract_strided_slice %254 {offsets = [0, 0], sizes = [8, 32], strides = [1, 1]} : vector<8x128xf32> to vector<8x32xf32>
    %257 = vector.extract_strided_slice %254 {offsets = [0, 32], sizes = [8, 32], strides = [1, 1]} : vector<8x128xf32> to vector<8x32xf32>
    %258 = vector.extract_strided_slice %255 {offsets = [0, 64], sizes = [8, 32], strides = [1, 1]} : vector<8x128xf32> to vector<8x32xf32>
    %259 = vector.extract_strided_slice %254 {offsets = [0, 96], sizes = [8, 32], strides = [1, 1]} : vector<8x128xf32> to vector<8x32xf32>
    %260 = arith.mulf %257, %225 : vector<8x32xf32>
    %261 = arith.mulf %256, %258 : vector<8x32xf32>
    %262 = arith.addf %260, %261 : vector<8x32xf32>
    %263 = math.tanh %262 : vector<8x32xf32>
    %264 = arith.mulf %259, %263 : vector<8x32xf32>
    %cst_60 = arith.constant dense<0.000000e+00> : vector<8x128xf32>
    %265 = tpu.matmul %264, %13, %cst_60 {dimension_numbers = #tpu.dot_dimension_numbers<[1], [0], [0], [1], [0, 0, 1, 1], [], []>} : vector<8x32xf32>, vector<32x128xf32>, vector<8x128xf32> -> vector<8x128xf32>
    %266 = arith.addf %265, %17 : vector<8x128xf32>
    %cst_61 = arith.constant dense<0.000000e+00> : vector<8x128xf32>
    %267 = tpu.matmul %246, %11, %cst_61 {dimension_numbers = #tpu.dot_dimension_numbers<[1], [0], [0], [1], [0, 0, 1, 1], [], []>} : vector<8x32xf32>, vector<32x128xf32>, vector<8x128xf32> -> vector<8x128xf32>
    %268 = arith.addf %266, %267 : vector<8x128xf32>
    %269 = arith.negf %268 : vector<8x128xf32>
    %270 = math.exp %269 : vector<8x128xf32>
    %cst_62 = arith.constant 1.000000e+00 : f32
    %271 = vector.broadcast %cst_62 : f32 to vector<8x128xf32>
    %272 = arith.addf %271, %270 : vector<8x128xf32>
    %273 = arith.divf %271, %272 : vector<8x128xf32>
    %274 = math.tanh %268 : vector<8x128xf32>
    %275 = vector.extract_strided_slice %273 {offsets = [0, 0], sizes = [8, 32], strides = [1, 1]} : vector<8x128xf32> to vector<8x32xf32>
    %276 = vector.extract_strided_slice %273 {offsets = [0, 32], sizes = [8, 32], strides = [1, 1]} : vector<8x128xf32> to vector<8x32xf32>
    %277 = vector.extract_strided_slice %274 {offsets = [0, 64], sizes = [8, 32], strides = [1, 1]} : vector<8x128xf32> to vector<8x32xf32>
    %278 = vector.extract_strided_slice %273 {offsets = [0, 96], sizes = [8, 32], strides = [1, 1]} : vector<8x128xf32> to vector<8x32xf32>
    %279 = arith.mulf %276, %244 : vector<8x32xf32>
    %280 = arith.mulf %275, %277 : vector<8x32xf32>
    %281 = arith.addf %279, %280 : vector<8x32xf32>
    %282 = math.tanh %281 : vector<8x32xf32>
    %283 = arith.mulf %278, %282 : vector<8x32xf32>
    %284 = vector.extract_strided_slice %24 {offsets = [56, 0], sizes = [8, 128], strides = [1, 1]} : vector<64x128xf32> to vector<8x128xf32>
    %cst_63 = arith.constant dense<0.000000e+00> : vector<8x128xf32>
    %285 = tpu.matmul %264, %9, %cst_63 {dimension_numbers = #tpu.dot_dimension_numbers<[1], [0], [0], [1], [0, 0, 1, 1], [], []>} : vector<8x32xf32>, vector<32x128xf32>, vector<8x128xf32> -> vector<8x128xf32>
    %286 = arith.addf %284, %285 : vector<8x128xf32>
    %287 = arith.negf %286 : vector<8x128xf32>
    %288 = math.exp %287 : vector<8x128xf32>
    %cst_64 = arith.constant 1.000000e+00 : f32
    %289 = vector.broadcast %cst_64 : f32 to vector<8x128xf32>
    %290 = arith.addf %289, %288 : vector<8x128xf32>
    %291 = arith.divf %289, %290 : vector<8x128xf32>
    %292 = math.tanh %286 : vector<8x128xf32>
    %293 = vector.extract_strided_slice %291 {offsets = [0, 0], sizes = [8, 32], strides = [1, 1]} : vector<8x128xf32> to vector<8x32xf32>
    %294 = vector.extract_strided_slice %291 {offsets = [0, 32], sizes = [8, 32], strides = [1, 1]} : vector<8x128xf32> to vector<8x32xf32>
    %295 = vector.extract_strided_slice %292 {offsets = [0, 64], sizes = [8, 32], strides = [1, 1]} : vector<8x128xf32> to vector<8x32xf32>
    %296 = vector.extract_strided_slice %291 {offsets = [0, 96], sizes = [8, 32], strides = [1, 1]} : vector<8x128xf32> to vector<8x32xf32>
    %297 = arith.mulf %294, %262 : vector<8x32xf32>
    %298 = arith.mulf %293, %295 : vector<8x32xf32>
    %299 = arith.addf %297, %298 : vector<8x32xf32>
    %300 = math.tanh %299 : vector<8x32xf32>
    %301 = arith.mulf %296, %300 : vector<8x32xf32>
    %cst_65 = arith.constant dense<0.000000e+00> : vector<8x128xf32>
    %302 = tpu.matmul %301, %13, %cst_65 {dimension_numbers = #tpu.dot_dimension_numbers<[1], [0], [0], [1], [0, 0, 1, 1], [], []>} : vector<8x32xf32>, vector<32x128xf32>, vector<8x128xf32> -> vector<8x128xf32>
    %303 = arith.addf %302, %17 : vector<8x128xf32>
    %cst_66 = arith.constant dense<0.000000e+00> : vector<8x128xf32>
    %304 = tpu.matmul %283, %11, %cst_66 {dimension_numbers = #tpu.dot_dimension_numbers<[1], [0], [0], [1], [0, 0, 1, 1], [], []>} : vector<8x32xf32>, vector<32x128xf32>, vector<8x128xf32> -> vector<8x128xf32>
    %305 = arith.addf %303, %304 : vector<8x128xf32>
    %306 = arith.negf %305 : vector<8x128xf32>
    %307 = math.exp %306 : vector<8x128xf32>
    %cst_67 = arith.constant 1.000000e+00 : f32
    %308 = vector.broadcast %cst_67 : f32 to vector<8x128xf32>
    %309 = arith.addf %308, %307 : vector<8x128xf32>
    %310 = arith.divf %308, %309 : vector<8x128xf32>
    %311 = math.tanh %305 : vector<8x128xf32>
    %312 = vector.extract_strided_slice %310 {offsets = [0, 0], sizes = [8, 32], strides = [1, 1]} : vector<8x128xf32> to vector<8x32xf32>
    %313 = vector.extract_strided_slice %310 {offsets = [0, 32], sizes = [8, 32], strides = [1, 1]} : vector<8x128xf32> to vector<8x32xf32>
    %314 = vector.extract_strided_slice %311 {offsets = [0, 64], sizes = [8, 32], strides = [1, 1]} : vector<8x128xf32> to vector<8x32xf32>
    %315 = vector.extract_strided_slice %310 {offsets = [0, 96], sizes = [8, 32], strides = [1, 1]} : vector<8x128xf32> to vector<8x32xf32>
    %316 = arith.mulf %313, %281 : vector<8x32xf32>
    %317 = arith.mulf %312, %314 : vector<8x32xf32>
    %318 = arith.addf %316, %317 : vector<8x32xf32>
    %319 = math.tanh %318 : vector<8x32xf32>
    %320 = arith.mulf %315, %319 : vector<8x32xf32>
    %c0_68 = arith.constant 0 : index
    %c0_69 = arith.constant 0 : index
    %c0_70 = arith.constant 0 : index
    %321 = vector.load %arg11[%c0_68, %c0_69, %c0_70] : memref<2x8x32xf32, #tpu.memory_space<vmem>>, vector<1x8x32xf32>
    %322 = vector.shape_cast %321 : vector<1x8x32xf32> to vector<8x32xf32>
    %323 = vector.shape_cast %301 : vector<8x32xf32> to vector<1x8x32xf32>
    tpu.vector_store %arg11[%c0_68, %c0_69, %c0_70], %323 {strides = array<i32>} : memref<2x8x32xf32, #tpu.memory_space<vmem>>, vector<1x8x32xf32>,
    %c0_71 = arith.constant 0 : index
    %c0_72 = arith.constant 0 : index
    %c0_73 = arith.constant 0 : index
    %324 = vector.load %arg12[%c0_71, %c0_72, %c0_73] : memref<2x8x32xf32, #tpu.memory_space<vmem>>, vector<1x8x32xf32>
    %325 = vector.shape_cast %324 : vector<1x8x32xf32> to vector<8x32xf32>
    %326 = vector.shape_cast %299 : vector<8x32xf32> to vector<1x8x32xf32>
    tpu.vector_store %arg12[%c0_71, %c0_72, %c0_73], %326 {strides = array<i32>} : memref<2x8x32xf32, #tpu.memory_space<vmem>>, vector<1x8x32xf32>,
    %c1_74 = arith.constant 1 : index
    %c0_75 = arith.constant 0 : index
    %c0_76 = arith.constant 0 : index
    %327 = vector.load %arg11[%c1_74, %c0_75, %c0_76] : memref<2x8x32xf32, #tpu.memory_space<vmem>>, vector<1x8x32xf32>
    %328 = vector.shape_cast %327 : vector<1x8x32xf32> to vector<8x32xf32>
    %329 = vector.shape_cast %320 : vector<8x32xf32> to vector<1x8x32xf32>
    tpu.vector_store %arg11[%c1_74, %c0_75, %c0_76], %329 {strides = array<i32>} : memref<2x8x32xf32, #tpu.memory_space<vmem>>, vector<1x8x32xf32>,
    %c1_77 = arith.constant 1 : index
    %c0_78 = arith.constant 0 : index
    %c0_79 = arith.constant 0 : index
    %330 = vector.load %arg12[%c1_77, %c0_78, %c0_79] : memref<2x8x32xf32, #tpu.memory_space<vmem>>, vector<1x8x32xf32>
    %331 = vector.shape_cast %330 : vector<1x8x32xf32> to vector<8x32xf32>
    %332 = vector.shape_cast %318 : vector<8x32xf32> to vector<1x8x32xf32>
    tpu.vector_store %arg12[%c1_77, %c0_78, %c0_79], %332 {strides = array<i32>} : memref<2x8x32xf32, #tpu.memory_space<vmem>>, vector<1x8x32xf32>,
    %c0_80 = arith.constant 0 : index
    %c0_81 = arith.constant 0 : index
    %333 = vector.load %arg8[%c0_80, %c0_81] : memref<32x1xf32, #tpu.memory_space<vmem>>, vector<32x1xf32>
    %cst_82 = arith.constant dense<0.000000e+00> : vector<8x1xf32>
    %334 = tpu.matmul %320, %333, %cst_82 {dimension_numbers = #tpu.dot_dimension_numbers<[1], [0], [0], [1], [0, 0, 1, 1], [], []>} : vector<8x32xf32>, vector<32x1xf32>, vector<8x1xf32> -> vector<8x1xf32>
    %c0_83 = arith.constant 0 : index
    %c0_84 = arith.constant 0 : index
    %335 = vector.load %arg9[%c0_83, %c0_84] : memref<1x1xf32, #tpu.memory_space<vmem>>, vector<1x1xf32>
    %336 = vector.broadcast %335 : vector<1x1xf32> to vector<8x1xf32>
    %337 = arith.addf %334, %336 : vector<8x1xf32>
    %c0_85 = arith.constant 0 : index
    %c0_86 = arith.constant 0 : index
    %338 = vector.load %arg10[%c0_85, %c0_86] : memref<8x1xf32, #tpu.memory_space<vmem>>, vector<8x1xf32>
    tpu.vector_store %arg10[%c0_85, %c0_86], %337 {strides = array<i32>} : memref<8x1xf32, #tpu.memory_space<vmem>>, vector<8x1xf32>,
    return
  }
}

</mosaic_0001>

<bundles_post_ra>
// kernel: tpu_custom_call.1
= control target key start
LH: loop header
LB: loop body
LE: loop exit
PB: predicated region body
PF: predicated region fallthrough
CT: control target
= control target key end

     0   :  { %vm77_vm0 = vcmask 130048   ;;  %vm143_vm1 = vcmask 261120   ;;  %s1582_s20 = smov 64   ;;  %s1583_s23 = smov 32   ;;  %s2079_s5 = inlined_call_operand.vmem [shape: f32[2,32,128], index: 5, kind: input, shape index: {}]   ;;  %s2080_s3 = inlined_call_operand.vmem [shape: f32[16,128], index: 3, kind: input, shape index: {}]   ;;  %s2081_s0 = inlined_call_operand.vmem [shape: f32[64,16], index: 0, kind: input, shape index: {}]   ;;  %s2082_s4 = inlined_call_operand.vmem [shape: f32[1,128], index: 4, kind: input, shape index: {}]   ;;  %s2083_s1 = inlined_call_operand.vmem [shape: f32[2,8,32], index: 1, kind: input, shape index: {}, may-alias: {1,11}]   ;;  %s2084_s2 = inlined_call_operand.vmem [shape: f32[2,8,32], index: 2, kind: input, shape index: {}, may-alias: {2,12}]   ;;  %s2085_s6 = inlined_call_operand.vmem [shape: f32[1,32,128], index: 6, kind: input, shape index: {}]   ;;  %s2086_s7 = inlined_call_operand.vmem [shape: f32[1,1,128], index: 7, kind: input, shape index: {}]   ;;  %s2087_s11 = inlined_call_operand.vmem [shape: f32[2,8,32], index: 11, kind: output, shape index: {1}, may-alias: {1,11}]   ;;  %s2088_s12 = inlined_call_operand.vmem [shape: f32[2,8,32], index: 12, kind: output, shape index: {2}, may-alias: {2,12}]   ;;  %s2089_s8 = inlined_call_operand.vmem [shape: f32[32,1], index: 8, kind: input, shape index: {}]   ;;  %s2090_s9 = inlined_call_operand.<no memory space> [shape: f32[1,1], index: 9, kind: input, shape index: {}]   ;;  %s2091_s10 = inlined_call_operand.vmem [shape: f32[8,1], index: 10, kind: output, shape index: {0}]  }
   0x1   :  { %v1653_v0 = vld [vmem:[%s2079_s5 + $0x18] sm:$0xff]  ;;  %v72_v1 = vld [vmem:[%s2080_s3 + $0x8] sm:$0xff]  ;;  %v1661_v2 = vld [vmem:[%s2079_s5 + $0x10] sm:$0xff]  ;;  %s1584_s15 = smov 96  }
   0x2   :  { %159 = vmatpush.msra.mxu1 %v1653_v0  ;;  %116 = vmatpush.msra.mxu0 %v72_v1  ;;  %v71_v3 = vld [vmem:[%s2080_s3] sm:$0xff]  ;;  %v1673_v5 = vld [vmem:[%s2079_s5 + $0x8] sm:$0xff]  ;;  %v1715_v35 = vld [vmem:[%s2085_s6 + $0x18] sm:$0xff] }
   0x3   :  { %v63_v4 = vld [vmem:[%s2081_s0] sm:$0xff]  ;;  %v1720_v36 = vld [vmem:[%s2085_s6 + $0x10] sm:$0xff]  ;;  %v1725_v37 = vld [vmem:[%s2079_s5 + $0x38] sm:$0xff]  ;;  %226 = vmatpush.msra.mxu2 %v1715_v35 }
   0x4   :  { %160 = vmatpush.msra.mxu1 %v1661_v2  ;;  %117 = vmatpush.msra.mxu0 %v71_v3  ;;  %v1680_v6 = vld [vmem:[%s2079_s5] sm:$0xff]  ;;  %v1732_v38 = vld [vmem:[%s2079_s5 + $0x30] sm:$0xff]  ;;  %v64_v39 = vld [vmem:[%s2081_s0 + $0x8] sm:$0xff] }
   0x5   :  { %1390 = vmatmul.msk.f32.vlgmr.msra.gmra.mxu0 %vm77_vm0, %v63_v4  ;;  %v40_v7 = vld [vmem:[%s2083_s1] sm:$0xff]  ;;  %249 = vmatpush.msra.mxu3 %v1725_v37  ;;  %v1740_v40 = vld [vmem:[%s2085_s6 + $0x8] sm:$0xff] }
   0x6   :  { %161 = vmatpush.msra.mxu1 %v1673_v5  ;;  %v1699_v8 = vld [vmem:[%s2082_s4] ss:$0 sm:$0xff]  ;;  %v1746_v41 = vld [vmem:[%s2079_s5 + $0x28] sm:$0xff]  ;;  %227 = vmatpush.msra.mxu2 %v1720_v36 }
   0x7   :  { %v43_v14 = vld [vmem:[%s2084_s2] sm:$0xff]  ;;  %250 = vmatpush.msra.mxu3 %v1732_v38  ;;  %v1384_v46 = vld [vmem:[%s2083_s1 + $0x8] sm:$0xff] }
   0x8   :  { %162 = vmatpush.msra.mxu1 %v1680_v6  ;;  %v1753_v42 = vld [vmem:[%s2085_s6] sm:$0xff]  ;;  %228 = vmatpush.msra.mxu2 %v1740_v40  ;;  %v1385_v47 = vld [vmem:[%s2084_s2 + $0x8] sm:$0xff] }
   0x9   :  { %1398 = vmatmul.msk.f32.vlgmr.msra.gmra.mxu1 %vm143_vm1, %v40_v7  ;;  %251 = vmatpush.msra.mxu3 %v1746_v41  ;;  %v1766_v45 = vld [vmem:[%s2079_s5 + $0x20] sm:$0xff] }
   0xa   :  { %311 = vmatpush.msrb.mxu1 %v1653_v0  ;;  %229 = vmatpush.msra.mxu2 %v1753_v42  ;;  %v1799_v53 = vld [vmem:[%s2086_s7] ss:$0 sm:$0xff] }
   0xb   :  { %252 = vmatpush.msra.mxu3 %v1766_v45 }
   0xc   :  { %312 = vmatpush.msrb.mxu1 %v1661_v2  ;;  %374 = vmatpush.msrb.mxu2 %v1715_v35 }
   0xd   :  { %1391 = vmatmul.msk.f32.gmra.mxu0 %vm77_vm0, %v64_v39  ;;  %1401 = vmatmul.msk.f32.vlgmr.msra.gmra.mxu3 %vm143_vm1, %v1384_v46 }
   0xe   :  { %313 = vmatpush.msrb.mxu1 %v1673_v5  ;;  %375 = vmatpush.msrb.mxu2 %v1720_v36 }
   0xf   :  { %399 = vmatpush.msrb.mxu3 %v1725_v37 }
  0x10   :  { %314 = vmatpush.msrb.mxu1 %v1680_v6  ;;  %376 = vmatpush.msrb.mxu2 %v1740_v40 }
  0x11   :  { %400 = vmatpush.msrb.mxu3 %v1732_v38 }
  0x12   :  { %457 = vmatpush.msra.mxu1 %v1653_v0  ;;  %377 = vmatpush.msrb.mxu2 %v1753_v42 }
  0x13   :  { %401 = vmatpush.msrb.mxu3 %v1746_v41 }
  0x14   :  { %458 = vmatpush.msra.mxu1 %v1661_v2 }
  0x15   :  { %402 = vmatpush.msrb.mxu3 %v1766_v45 }
  0x16   :  { %459 = vmatpush.msra.mxu1 %v1673_v5 }
  0x17   :  { %545 = vmatpush.msra.mxu3 %v1725_v37 }
  0x18   :  { %460 = vmatpush.msra.mxu1 %v1680_v6 }
  0x19   :  { %546 = vmatpush.msra.mxu3 %v1732_v38 }
  0x1b   :  { %547 = vmatpush.msra.mxu3 %v1746_v41 }
  0x1d   :  { %548 = vmatpush.msra.mxu3 %v1766_v45 }
  0x82   :  { %v119_v9 = vpop.f32.mrf.mxu0 }
  0x83   :  { %v120_v10 = vadd.f32 %v1699_v8, %v119_v9 }
  0x86   :  { %v164_v11 = vpop.f32.mrf.mxu1 }
  0x87   :  { %v167_v12 = vadd.f32 %v164_v11, %v120_v10 }
  0x89   :  { %1447 = vtanh.f32 %v167_v12  ;;  %v1399_v15 = vmul.f32 -1.442695, %v167_v12 }
  0x8a   :  { %v122_v49 = vpop.f32.mrf.mxu0 }
  0x8b   :  { %1449 = vpow2.f32 %v1399_v15  ;;  %v123_v50 = vadd.f32 %v1699_v8, %v122_v49 }
  0x8f   :  { %v1448_v13 = vpop.eup %1447 }
  0x90   :  { %194 = vrot.lane.b32.xlu0 %v1448_v13, %s1582_s20  ;;  %v254_v55 = vpop.f32.mrf.mxu3 }
  0x91   :  { %v1450_v16 = vpop.eup %1449 }
  0x92   :  { %v171_v17 = vadd.f32 1.0, %v1450_v16 }
  0x94   :  { %1451 = vrcp.f32 %v171_v17  ;;  %v183_v23 = vand.u32 2147483648, %v171_v17  ;;  %vm177_vm3 = vweird.f32 %v171_v17  ;;  %v181_v24 = vand.u32 2147483647, %v171_v17 }
  0x96   :  { %v184_v26 = vor.u32 1.1754944e-38, %v183_v23  ;;  %vm182_vm5 = vcmp.eq.f32.partialorder %v181_v24, 8.507059e+37 }
  0x98   :  { %189 = vrot.lane.b32.xlu0 %v43_v14, %s1583_s23 }
  0x9a   :  { %v1452_v18 = vpop.eup %1451 }
  0x9b   :  { %v173_v19 = vmul.f32 %v1452_v18, %v171_v17  ;;  %vm178_vm2 = vweird.f32 %v1452_v18 }
  0x9c   :  { %vm179_vm4 = vmor %vm177_vm3, %vm178_vm2 }
  0x9d   :  { %v174_v20 = vsub.f32 1.0, %v173_v19 }
  0x9f   :  { %v175_v21 = vmul.f32 %v1452_v18, %v174_v20 }
  0xa1   :  { %v176_v22 = vadd.f32 %v1452_v18, %v175_v21 }
  0xa3   :  { %v180_v25 = vsel %vm179_vm4, %v1452_v18, %v176_v22 }
  0xa4   :  { %v185_v28 = vsel %vm182_vm5, %v184_v26, %v180_v25 }
 0x102   :  { %v195_v27 = vpop.permute.xlu0 %194 }
 0x103   :  { %v197_v29 = vmul.f32 %v195_v27, %v185_v28 }
 0x105   :  { %199 = vrot.lane.b32.xlu1 %v197_v29, %s1583_s23 }
 0x10a   :  { %v190_v30 = vpop.permute.xlu0 %189 }
 0x10b   :  { %v192_v31 = vmul.f32 %v190_v30, %v185_v28 }
 0x177   :  { %v200_v32 = vpop.permute.xlu1 %199 }
 0x178   :  { %v1708_v33 = vadd.f32 %v200_v32, %v192_v31 }
 0x17a   :  { %1453 = vtanh.f32 %v1708_v33 }
 0x180   :  { %v1454_v34 = vpop.eup %1453 }
 0x181   :  { %205 = vrot.lane.b32.xlu1 %v1454_v34, %s1582_s20 }
 0x189   :  { %279 = vrot.lane.b32.xlu1 %v1385_v47, %s1583_s23 }
 0x1f3   :  { %v206_v43 = vpop.permute.xlu1 %205 }
 0x1f4   :  { %v208_v44 = vmul.f32 %v206_v43, %v185_v28 }
 0x1f6   :  { %210 = vrot.lane.b32.xlu2 %v208_v44, %s1583_s23 }
 0x1fb   :  { %v280_v43 = vpop.permute.xlu1 %279 }
 0x250   :  { %v211_v48 = vpop.permute.xlu2 %210 }
 0x251   :  { %1400 = vmatmul.msk.f32.vlgmr.msra.gmra.mxu2 %vm143_vm1, %v211_v48  ;;  %1403 = vmatmul.msk.f32.vlgmr.msrb.gmra.mxu1 %vm143_vm1, %v211_v48 }
 0x252   :  { %520 = vmatpush.msra.mxu2 %v1715_v35  ;;  %603 = vmatpush.msrb.mxu1 %v1653_v0 }
 0x254   :  { %521 = vmatpush.msra.mxu2 %v1720_v36  ;;  %604 = vmatpush.msrb.mxu1 %v1661_v2 }
 0x256   :  { %522 = vmatpush.msra.mxu2 %v1740_v40  ;;  %605 = vmatpush.msrb.mxu1 %v1673_v5 }
 0x258   :  { %523 = vmatpush.msra.mxu2 %v1753_v42  ;;  %606 = vmatpush.msrb.mxu1 %v1680_v6 }
 0x2ce   :  { %v316_v51 = vpop.f32.mrf.mxu1 }
 0x2cf   :  { %v319_v52 = vadd.f32 %v316_v51, %v123_v50  ;;  %v65_v50 = vld [vmem:[%s2081_s0 + $0x10] sm:$0xff] }
 0x2d0   :  { %1392 = vmatmul.msk.f32.gmra.mxu0 %vm77_vm0, %v65_v50 }
 0x2d1   :  { %1455 = vtanh.f32 %v319_v52  ;;  %v1404_v60 = vmul.f32 -1.442695, %v319_v52 }
 0x2d4   :  { %v231_v54 = vpop.f32.mrf.mxu2 }
 0x2d5   :  { %v232_v56 = vadd.f32 %v1799_v53, %v231_v54 }
 0x2d7   :  { %v1456_v57 = vpop.eup %1455  ;;  %v257_v58 = vadd.f32 %v254_v55, %v232_v56 }
 0x2d8   :  { %342 = vrot.lane.b32.xlu2 %v1456_v57, %s1582_s20 }
 0x2d9   :  { %1457 = vtanh.f32 %v257_v58  ;;  %v1402_v4 = vmul.f32 -1.442695, %v257_v58 }
 0x2da   :  { %1459 = vpow2.f32 %v1404_v60 }
 0x2df   :  { %v1458_v59 = vpop.eup %1457 }
 0x2e0   :  { %284 = vrot.lane.b32.xlu0 %v1458_v59, %s1582_s20  ;;  %v1460_v61 = vpop.eup %1459 }
 0x2e1   :  { %v323_v62 = vadd.f32 1.0, %v1460_v61 }
 0x2e3   :  { %1461 = vrcp.f32 %v323_v62  ;;  %v335_v10 = vand.u32 2147483648, %v323_v62  ;;  %vm329_vm7 = vweird.f32 %v323_v62  ;;  %v333_v11 = vand.u32 2147483647, %v323_v62 }
 0x2e4   :  { %1463 = vpow2.f32 %v1402_v4 }
 0x2e5   :  { %v336_v14 = vor.u32 1.1754944e-38, %v335_v10  ;;  %vm334_vm9 = vcmp.eq.f32.partialorder %v333_v11, 8.507059e+37 }
 0x2e9   :  { %v1462_v63 = vpop.eup %1461 }
 0x2ea   :  { %v325_v1 = vmul.f32 %v1462_v63, %v323_v62  ;;  %vm330_vm6 = vweird.f32 %v1462_v63  ;;  %v1464_v12 = vpop.eup %1463 }
 0x2eb   :  { %vm331_vm8 = vmor %vm329_vm7, %vm330_vm6  ;;  %v261_v15 = vadd.f32 1.0, %v1464_v12 }
 0x2ec   :  { %v326_v3 = vsub.f32 1.0, %v325_v1 }
 0x2ed   :  { %1465 = vrcp.f32 %v261_v15  ;;  %v273_v24 = vand.u32 2147483648, %v261_v15  ;;  %vm267_vm11 = vweird.f32 %v261_v15  ;;  %v271_v25 = vand.u32 2147483647, %v261_v15 }
 0x2ee   :  { %v327_v7 = vmul.f32 %v1462_v63, %v326_v3 }
 0x2ef   :  { %v274_v27 = vor.u32 1.1754944e-38, %v273_v24  ;;  %vm272_vm13 = vcmp.eq.f32.partialorder %v271_v25, 8.507059e+37 }
 0x2f0   :  { %v328_v9 = vadd.f32 %v1462_v63, %v327_v7 }
 0x2f2   :  { %v332_v13 = vsel %vm331_vm8, %v1462_v63, %v328_v9 }
 0x2f3   :  { %v337_v17 = vsel %vm334_vm9, %v336_v14, %v332_v13  ;;  %v1466_v19 = vpop.eup %1465 }
 0x2f4   :  { %v263_v20 = vmul.f32 %v1466_v19, %v261_v15  ;;  %vm268_vm10 = vweird.f32 %v1466_v19  ;;  %v340_v31 = vmul.f32 %v337_v17, %v1708_v33 }
 0x2f5   :  { %vm269_vm12 = vmor %vm267_vm11, %vm268_vm10 }
 0x2f6   :  { %v264_v21 = vsub.f32 1.0, %v263_v20 }
 0x2f8   :  { %v265_v22 = vmul.f32 %v1466_v19, %v264_v21 }
 0x2fa   :  { %v266_v23 = vadd.f32 %v1466_v19, %v265_v22 }
 0x2fc   :  { %v270_v26 = vsel %vm269_vm12, %v1466_v19, %v266_v23 }
 0x2fd   :  { %v275_v28 = vsel %vm272_vm13, %v274_v27, %v270_v26 }
 0x2fe   :  { %v282_v44 = vmul.f32 %v280_v43, %v275_v28 }
 0x332   :  { %v343_v16 = vpop.permute.xlu2 %342 }
 0x333   :  { %v345_v18 = vmul.f32 %v343_v16, %v337_v17 }
 0x335   :  { %347 = vrot.lane.b32.xlu2 %v345_v18, %s1583_s23 }
 0x34d   :  { %v125_v56 = vpop.f32.mrf.mxu0 }
 0x34e   :  { %v126_v57 = vadd.f32 %v1699_v8, %v125_v56 }
 0x352   :  { %v285_v29 = vpop.permute.xlu0 %284 }
 0x353   :  { %v287_v30 = vmul.f32 %v285_v29, %v275_v28 }
 0x355   :  { %289 = vrot.lane.b32.xlu0 %v287_v30, %s1583_s23 }
 0x38f   :  { %v348_v32 = vpop.permute.xlu2 %347 }
 0x390   :  { %v1807_v34 = vadd.f32 %v348_v32, %v340_v31 }
 0x392   :  { %1467 = vtanh.f32 %v1807_v34 }
 0x398   :  { %v1468_v39 = vpop.eup %1467 }
 0x399   :  { %353 = vrot.lane.b32.xlu1 %v1468_v39, %s1582_s20 }
 0x3c7   :  { %v290_v46 = vpop.permute.xlu0 %289 }
 0x3c8   :  { %v1811_v47 = vadd.f32 %v290_v46, %v282_v44 }
 0x3ca   :  { %1469 = vtanh.f32 %v1811_v47 }
 0x3d0   :  { %v1470_v48 = vpop.eup %1469 }
 0x3d1   :  { %295 = vrot.lane.b32.xlu2 %v1470_v48, %s1582_s20 }
 0x40b   :  { %v354_v49 = vpop.permute.xlu1 %353 }
 0x40c   :  { %v356_v33 = vmul.f32 %v354_v49, %v337_v17 }
 0x40e   :  { %358 = vrot.lane.b32.xlu0 %v356_v33, %s1583_s23 }
 0x42b   :  { %v296_v51 = vpop.permute.xlu2 %295 }
 0x42c   :  { %v298_v52 = vmul.f32 %v296_v51, %v275_v28 }
 0x42e   :  { %383 = vrot.lane.b32.xlu1 %v298_v52, %s1583_s23 }
 0x480   :  { %v359_v54 = vpop.permute.xlu0 %358 }
 0x481   :  { %1405 = vmatmul.msk.f32.vlgmr.msrb.gmra.mxu2 %vm143_vm1, %v359_v54  ;;  %1408 = vmatmul.msk.f32.vlgmr.msra.gmra.mxu1 %vm143_vm1, %v359_v54 }
 0x482   :  { %666 = vmatpush.msrb.mxu2 %v1715_v35  ;;  %749 = vmatpush.msra.mxu1 %v1653_v0 }
 0x484   :  { %667 = vmatpush.msrb.mxu2 %v1720_v36  ;;  %750 = vmatpush.msra.mxu1 %v1661_v2 }
 0x486   :  { %668 = vmatpush.msrb.mxu2 %v1740_v40  ;;  %751 = vmatpush.msra.mxu1 %v1673_v5 }
 0x488   :  { %669 = vmatpush.msrb.mxu2 %v1753_v42  ;;  %752 = vmatpush.msra.mxu1 %v1680_v6 }
 0x4a0   :  { %v384_v55 = vpop.permute.xlu1 %383 }
 0x4a1   :  { %1406 = vmatmul.msk.f32.vlgmr.msrb.gmra.mxu3 %vm143_vm1, %v384_v55 }
 0x4a2   :  { %691 = vmatpush.msrb.mxu3 %v1725_v37 }
 0x4a4   :  { %692 = vmatpush.msrb.mxu3 %v1732_v38 }
 0x4a6   :  { %693 = vmatpush.msrb.mxu3 %v1746_v41 }
 0x4a8   :  { %694 = vmatpush.msrb.mxu3 %v1766_v45 }
 0x4fe   :  { %v462_v58 = vpop.f32.mrf.mxu1 }
 0x4ff   :  { %v465_v59 = vadd.f32 %v462_v58, %v126_v57  ;;  %v66_v57 = vld [vmem:[%s2081_s0 + $0x18] sm:$0xff] }
 0x500   :  { %1393 = vmatmul.msk.f32.gmra.mxu0 %vm77_vm0, %v66_v57 }
 0x501   :  { %1471 = vtanh.f32 %v465_v59  ;;  %v1409_v4 = vmul.f32 -1.442695, %v465_v59 }
 0x504   :  { %v379_v61 = vpop.f32.mrf.mxu2 }
 0x505   :  { %v380_v62 = vadd.f32 %v1799_v53, %v379_v61 }
 0x507   :  { %v1472_v60 = vpop.eup %1471 }
 0x508   :  { %488 = vrot.lane.b32.xlu2 %v1472_v60, %s1582_s20 }
 0x524   :  { %v404_v63 = vpop.f32.mrf.mxu3 }
 0x525   :  { %v407_v1 = vadd.f32 %v404_v63, %v380_v62 }
 0x527   :  { %1473 = vtanh.f32 %v407_v1  ;;  %v1407_v22 = vmul.f32 -1.442695, %v407_v1 }
 0x528   :  { %1475 = vpow2.f32 %v1409_v4 }
 0x52d   :  { %v1474_v3 = vpop.eup %1473 }
 0x52e   :  { %430 = vrot.lane.b32.xlu0 %v1474_v3, %s1582_s20  ;;  %v1476_v7 = vpop.eup %1475 }
 0x52f   :  { %v469_v9 = vadd.f32 1.0, %v1476_v7 }
 0x531   :  { %1477 = vrcp.f32 %v469_v9  ;;  %v481_v15 = vand.u32 2147483648, %v469_v9  ;;  %vm475_vm15 = vweird.f32 %v469_v9  ;;  %v479_v16 = vand.u32 2147483647, %v469_v9 }
 0x532   :  { %1479 = vpow2.f32 %v1407_v22 }
 0x533   :  { %v482_v18 = vor.u32 1.1754944e-38, %v481_v15  ;;  %vm480_vm3 = vcmp.eq.f32.partialorder %v479_v16, 8.507059e+37 }
 0x537   :  { %v1478_v10 = vpop.eup %1477 }
 0x538   :  { %v471_v11 = vmul.f32 %v1478_v10, %v469_v9  ;;  %vm476_vm14 = vweird.f32 %v1478_v10  ;;  %v1480_v23 = vpop.eup %1479 }
 0x539   :  { %vm477_vm2 = vmor %vm475_vm15, %vm476_vm14  ;;  %v411_v24 = vadd.f32 1.0, %v1480_v23 }
 0x53a   :  { %v472_v12 = vsub.f32 1.0, %v471_v11 }
 0x53b   :  { %1481 = vrcp.f32 %v411_v24  ;;  %v423_v30 = vand.u32 2147483648, %v411_v24  ;;  %vm417_vm5 = vweird.f32 %v411_v24  ;;  %v421_v31 = vand.u32 2147483647, %v411_v24 }
 0x53c   :  { %v473_v13 = vmul.f32 %v1478_v10, %v472_v12 }
 0x53d   :  { %v424_v39 = vor.u32 1.1754944e-38, %v423_v30  ;;  %vm422_vm7 = vcmp.eq.f32.partialorder %v421_v31, 8.507059e+37 }
 0x53e   :  { %v474_v14 = vadd.f32 %v1478_v10, %v473_v13 }
 0x540   :  { %v478_v17 = vsel %vm477_vm2, %v1478_v10, %v474_v14 }
 0x541   :  { %v483_v20 = vsel %vm480_vm3, %v482_v18, %v478_v17  ;;  %v1482_v25 = vpop.eup %1481 }
 0x542   :  { %v413_v26 = vmul.f32 %v1482_v25, %v411_v24  ;;  %vm418_vm4 = vweird.f32 %v1482_v25  ;;  %v486_v48 = vmul.f32 %v483_v20, %v1807_v34 }
 0x543   :  { %vm419_vm6 = vmor %vm417_vm5, %vm418_vm4 }
 0x544   :  { %v414_v27 = vsub.f32 1.0, %v413_v26 }
 0x546   :  { %v415_v28 = vmul.f32 %v1482_v25, %v414_v27 }
 0x548   :  { %v416_v29 = vadd.f32 %v1482_v25, %v415_v28 }
 0x54a   :  { %v420_v32 = vsel %vm419_vm6, %v1482_v25, %v416_v29 }
 0x54b   :  { %v425_v44 = vsel %vm422_vm7, %v424_v39, %v420_v32 }
 0x54c   :  { %v428_v51 = vmul.f32 %v425_v44, %v1811_v47 }
 0x562   :  { %v489_v19 = vpop.permute.xlu2 %488 }
 0x563   :  { %v491_v21 = vmul.f32 %v489_v19, %v483_v20 }
 0x565   :  { %493 = vrot.lane.b32.xlu1 %v491_v21, %s1583_s23 }
 0x57d   :  { %v128_v61 = vpop.f32.mrf.mxu0 }
 0x57e   :  { %v129_v62 = vadd.f32 %v1699_v8, %v128_v61 }
 0x5a0   :  { %v431_v43 = vpop.permute.xlu0 %430 }
 0x5a1   :  { %v433_v46 = vmul.f32 %v431_v43, %v425_v44 }
 0x5a3   :  { %435 = vrot.lane.b32.xlu2 %v433_v46, %s1583_s23 }
 0x5d7   :  { %v494_v49 = vpop.permute.xlu1 %493 }
 0x5d8   :  { %v1843_v33 = vadd.f32 %v494_v49, %v486_v48 }
 0x5da   :  { %1483 = vtanh.f32 %v1843_v33 }
 0x5e0   :  { %v1484_v50 = vpop.eup %1483 }
 0x5e1   :  { %499 = vrot.lane.b32.xlu0 %v1484_v50, %s1582_s20 }
 0x5fd   :  { %v436_v52 = vpop.permute.xlu2 %435 }
 0x5fe   :  { %v1848_v54 = vadd.f32 %v436_v52, %v428_v51 }
 0x600   :  { %1485 = vtanh.f32 %v1848_v54 }
 0x606   :  { %v1486_v55 = vpop.eup %1485 }
 0x607   :  { %441 = vrot.lane.b32.xlu1 %v1486_v55, %s1582_s20 }
 0x653   :  { %v500_v56 = vpop.permute.xlu0 %499 }
 0x654   :  { %v502_v34 = vmul.f32 %v500_v56, %v483_v20 }
 0x656   :  { %504 = vrot.lane.b32.xlu2 %v502_v34, %s1583_s23 }
 0x679   :  { %v442_v58 = vpop.permute.xlu1 %441 }
 0x67a   :  { %v444_v47 = vmul.f32 %v442_v58, %v425_v44 }
 0x67c   :  { %529 = vrot.lane.b32.xlu0 %v444_v47, %s1583_s23 }
 0x6b0   :  { %v505_v59 = vpop.permute.xlu2 %504 }
 0x6b1   :  { %1410 = vmatmul.msk.f32.vlgmr.msra.gmra.mxu2 %vm143_vm1, %v505_v59  ;;  %1413 = vmatmul.msk.f32.vlgmr.msrb.gmra.mxu1 %vm143_vm1, %v505_v59 }
 0x6b2   :  { %812 = vmatpush.msra.mxu2 %v1715_v35  ;;  %895 = vmatpush.msrb.mxu1 %v1653_v0 }
 0x6b4   :  { %813 = vmatpush.msra.mxu2 %v1720_v36  ;;  %896 = vmatpush.msrb.mxu1 %v1661_v2 }
 0x6b6   :  { %814 = vmatpush.msra.mxu2 %v1740_v40  ;;  %897 = vmatpush.msrb.mxu1 %v1673_v5 }
 0x6b8   :  { %815 = vmatpush.msra.mxu2 %v1753_v42  ;;  %898 = vmatpush.msrb.mxu1 %v1680_v6 }
 0x6ee   :  { %v530_v60 = vpop.permute.xlu0 %529 }
 0x6ef   :  { %1411 = vmatmul.msk.f32.vlgmr.msra.gmra.mxu3 %vm143_vm1, %v530_v60 }
 0x6f0   :  { %837 = vmatpush.msra.mxu3 %v1725_v37 }
 0x6f2   :  { %838 = vmatpush.msra.mxu3 %v1732_v38 }
 0x6f4   :  { %839 = vmatpush.msra.mxu3 %v1746_v41 }
 0x6f6   :  { %840 = vmatpush.msra.mxu3 %v1766_v45 }
 0x72e   :  { %v608_v63 = vpop.f32.mrf.mxu1 }
 0x72f   :  { %v611_v1 = vadd.f32 %v608_v63, %v129_v62  ;;  %v67_v62 = vld [vmem:[%s2081_s0 + $0x20] sm:$0xff] }
 0x730   :  { %1394 = vmatmul.msk.f32.gmra.mxu0 %vm77_vm0, %v67_v62 }
 0x731   :  { %1487 = vtanh.f32 %v611_v1  ;;  %v1414_v12 = vmul.f32 -1.442695, %v611_v1 }
 0x734   :  { %v525_v4 = vpop.f32.mrf.mxu2 }
 0x735   :  { %v526_v7 = vadd.f32 %v1799_v53, %v525_v4 }
 0x737   :  { %v1488_v3 = vpop.eup %1487 }
 0x738   :  { %634 = vrot.lane.b32.xlu1 %v1488_v3, %s1582_s20 }
 0x772   :  { %v550_v9 = vpop.f32.mrf.mxu3 }
 0x773   :  { %v553_v10 = vadd.f32 %v550_v9, %v526_v7 }
 0x775   :  { %1489 = vtanh.f32 %v553_v10  ;;  %v1412_v24 = vmul.f32 -1.442695, %v553_v10 }
 0x776   :  { %1491 = vpow2.f32 %v1414_v12 }
 0x77b   :  { %v1490_v11 = vpop.eup %1489 }
 0x77c   :  { %576 = vrot.lane.b32.xlu2 %v1490_v11, %s1582_s20  ;;  %v1492_v13 = vpop.eup %1491 }
 0x77d   :  { %v615_v14 = vadd.f32 1.0, %v1492_v13 }
 0x77f   :  { %1493 = vrcp.f32 %v615_v14  ;;  %v627_v20 = vand.u32 2147483648, %v615_v14  ;;  %vm621_vm9 = vweird.f32 %v615_v14  ;;  %v625_v21 = vand.u32 2147483647, %v615_v14 }
 0x780   :  { %1495 = vpow2.f32 %v1412_v24 }
 0x781   :  { %v628_v23 = vor.u32 1.1754944e-38, %v627_v20  ;;  %vm626_vm11 = vcmp.eq.f32.partialorder %v625_v21, 8.507059e+37 }
 0x785   :  { %v1494_v15 = vpop.eup %1493 }
 0x786   :  { %v617_v16 = vmul.f32 %v1494_v15, %v615_v14  ;;  %vm622_vm8 = vweird.f32 %v1494_v15  ;;  %v1496_v28 = vpop.eup %1495 }
 0x787   :  { %vm623_vm10 = vmor %vm621_vm9, %vm622_vm8  ;;  %v557_v29 = vadd.f32 1.0, %v1496_v28 }
 0x788   :  { %v618_v17 = vsub.f32 1.0, %v617_v16 }
 0x789   :  { %1497 = vrcp.f32 %v557_v29  ;;  %v569_v44 = vand.u32 2147483648, %v557_v29  ;;  %vm563_vm13 = vweird.f32 %v557_v29  ;;  %v567_v46 = vand.u32 2147483647, %v557_v29 }
 0x78a   :  { %v619_v18 = vmul.f32 %v1494_v15, %v618_v17 }
 0x78b   :  { %v570_v49 = vor.u32 1.1754944e-38, %v569_v44  ;;  %vm568_vm15 = vcmp.eq.f32.partialorder %v567_v46, 8.507059e+37 }
 0x78c   :  { %v620_v19 = vadd.f32 %v1494_v15, %v619_v18 }
 0x78e   :  { %v624_v22 = vsel %vm623_vm10, %v1494_v15, %v620_v19 }
 0x78f   :  { %v629_v25 = vsel %vm626_vm11, %v628_v23, %v624_v22  ;;  %v1498_v30 = vpop.eup %1497 }
 0x790   :  { %v559_v31 = vmul.f32 %v1498_v30, %v557_v29  ;;  %vm564_vm12 = vweird.f32 %v1498_v30  ;;  %v632_v55 = vmul.f32 %v629_v25, %v1843_v33 }
 0x791   :  { %vm565_vm14 = vmor %vm563_vm13, %vm564_vm12 }
 0x792   :  { %v560_v32 = vsub.f32 1.0, %v559_v31 }
 0x794   :  { %v561_v39 = vmul.f32 %v1498_v30, %v560_v32 }
 0x796   :  { %v562_v43 = vadd.f32 %v1498_v30, %v561_v39 }
 0x798   :  { %v566_v48 = vsel %vm565_vm14, %v1498_v30, %v562_v43 }
 0x799   :  { %v571_v51 = vsel %vm568_vm15, %v570_v49, %v566_v48 }
 0x79a   :  { %v574_v58 = vmul.f32 %v571_v51, %v1848_v54 }
 0x7aa   :  { %v635_v26 = vpop.permute.xlu1 %634 }
 0x7ab   :  { %v637_v27 = vmul.f32 %v635_v26, %v629_v25 }
 0x7ad   :  { %639 = vrot.lane.b32.xlu0 %v637_v27, %s1583_s23  ;;  %v131_v4 = vpop.f32.mrf.mxu0 }
 0x7ae   :  { %v132_v7 = vadd.f32 %v1699_v8, %v131_v4 }
 0x7d6   :  { %v577_v50 = vpop.permute.xlu2 %576 }
 0x7d7   :  { %v579_v52 = vmul.f32 %v577_v50, %v571_v51 }
 0x7d9   :  { %581 = vrot.lane.b32.xlu1 %v579_v52, %s1583_s23 }
 0x81f   :  { %v640_v56 = vpop.permute.xlu0 %639 }
 0x820   :  { %v1880_v34 = vadd.f32 %v640_v56, %v632_v55 }
 0x822   :  { %1499 = vtanh.f32 %v1880_v34 }
 0x828   :  { %v1500_v57 = vpop.eup %1499 }
 0x829   :  { %645 = vrot.lane.b32.xlu2 %v1500_v57, %s1582_s20 }
 0x84b   :  { %v582_v47 = vpop.permute.xlu1 %581 }
 0x84c   :  { %v1885_v59 = vadd.f32 %v582_v47, %v574_v58 }
 0x84e   :  { %1501 = vtanh.f32 %v1885_v59 }
 0x854   :  { %v1502_v60 = vpop.eup %1501 }
 0x855   :  { %587 = vrot.lane.b32.xlu0 %v1502_v60, %s1582_s20 }
 0x883   :  { %v646_v61 = vpop.permute.xlu2 %645 }
 0x884   :  { %v648_v33 = vmul.f32 %v646_v61, %v629_v25 }
 0x886   :  { %650 = vrot.lane.b32.xlu1 %v648_v33, %s1583_s23 }
 0x8c7   :  { %v588_v63 = vpop.permute.xlu0 %587 }
 0x8c8   :  { %v590_v54 = vmul.f32 %v588_v63, %v571_v51 }
 0x8ca   :  { %675 = vrot.lane.b32.xlu2 %v590_v54, %s1583_s23 }
 0x8f8   :  { %v651_v1 = vpop.permute.xlu1 %650 }
 0x8f9   :  { %1415 = vmatmul.msk.f32.vlgmr.msrb.gmra.mxu2 %vm143_vm1, %v651_v1  ;;  %1418 = vmatmul.msk.f32.vlgmr.msra.gmra.mxu1 %vm143_vm1, %v651_v1 }
 0x8fa   :  { %958 = vmatpush.msrb.mxu2 %v1715_v35  ;;  %1041 = vmatpush.msra.mxu1 %v1653_v0 }
 0x8fc   :  { %959 = vmatpush.msrb.mxu2 %v1720_v36  ;;  %1042 = vmatpush.msra.mxu1 %v1661_v2 }
 0x8fe   :  { %960 = vmatpush.msrb.mxu2 %v1740_v40  ;;  %1043 = vmatpush.msra.mxu1 %v1673_v5 }
 0x900   :  { %961 = vmatpush.msrb.mxu2 %v1753_v42  ;;  %1044 = vmatpush.msra.mxu1 %v1680_v6 }
 0x924   :  { %v676_v3 = vpop.permute.xlu2 %675 }
 0x925   :  { %1416 = vmatmul.msk.f32.vlgmr.msrb.gmra.mxu3 %vm143_vm1, %v676_v3 }
 0x926   :  { %983 = vmatpush.msrb.mxu3 %v1725_v37 }
 0x928   :  { %984 = vmatpush.msrb.mxu3 %v1732_v38 }
 0x92a   :  { %985 = vmatpush.msrb.mxu3 %v1746_v41 }
 0x92c   :  { %986 = vmatpush.msrb.mxu3 %v1766_v45 }
 0x976   :  { %v754_v9 = vpop.f32.mrf.mxu1 }
 0x977   :  { %v757_v10 = vadd.f32 %v754_v9, %v132_v7  ;;  %v68_v7 = vld [vmem:[%s2081_s0 + $0x28] sm:$0xff] }
 0x978   :  { %1395 = vmatmul.msk.f32.gmra.mxu0 %vm77_vm0, %v68_v7  ;;  %v1576_v7 = vld [vmem:[%s2085_s6 + $0x10] sm:$0xff] }
 0x979   :  { %1503 = vtanh.f32 %v757_v10  ;;  %v1419_v17 = vmul.f32 -1.442695, %v757_v10 }
 0x97c   :  { %v671_v12 = vpop.f32.mrf.mxu2 }
 0x97d   :  { %v672_v13 = vadd.f32 %v1799_v53, %v671_v12 }
 0x97f   :  { %v1504_v11 = vpop.eup %1503 }
 0x980   :  { %780 = vrot.lane.b32.xlu0 %v1504_v11, %s1582_s20 }
 0x9a8   :  { %v696_v14 = vpop.f32.mrf.mxu3 }
 0x9a9   :  { %v699_v15 = vadd.f32 %v696_v14, %v672_v13 }
 0x9ab   :  { %1505 = vtanh.f32 %v699_v15  ;;  %v1417_v32 = vmul.f32 -1.442695, %v699_v15 }
 0x9ac   :  { %1507 = vpow2.f32 %v1419_v17 }
 0x9b1   :  { %v1506_v16 = vpop.eup %1505 }
 0x9b2   :  { %722 = vrot.lane.b32.xlu1 %v1506_v16, %s1582_s20  ;;  %v1508_v18 = vpop.eup %1507 }
 0x9b3   :  { %v761_v19 = vadd.f32 1.0, %v1508_v18 }
 0x9b5   :  { %1509 = vrcp.f32 %v761_v19  ;;  %v773_v25 = vand.u32 2147483648, %v761_v19  ;;  %vm767_vm3 = vweird.f32 %v761_v19  ;;  %v771_v26 = vand.u32 2147483647, %v761_v19 }
 0x9b6   :  { %1511 = vpow2.f32 %v1417_v32 }
 0x9b7   :  { %v774_v28 = vor.u32 1.1754944e-38, %v773_v25  ;;  %vm772_vm5 = vcmp.eq.f32.partialorder %v771_v26, 8.507059e+37 }
 0x9bb   :  { %v1510_v20 = vpop.eup %1509 }
 0x9bc   :  { %v763_v21 = vmul.f32 %v1510_v20, %v761_v19  ;;  %vm768_vm2 = vweird.f32 %v1510_v20  ;;  %v1512_v39 = vpop.eup %1511 }
 0x9bd   :  { %vm769_vm4 = vmor %vm767_vm3, %vm768_vm2  ;;  %v703_v43 = vadd.f32 1.0, %v1512_v39 }
 0x9be   :  { %v764_v22 = vsub.f32 1.0, %v763_v21 }
 0x9bf   :  { %1513 = vrcp.f32 %v703_v43  ;;  %v715_v51 = vand.u32 2147483648, %v703_v43  ;;  %vm709_vm7 = vweird.f32 %v703_v43  ;;  %v713_v52 = vand.u32 2147483647, %v703_v43 }
 0x9c0   :  { %v765_v23 = vmul.f32 %v1510_v20, %v764_v22 }
 0x9c1   :  { %v716_v56 = vor.u32 1.1754944e-38, %v715_v51  ;;  %vm714_vm9 = vcmp.eq.f32.partialorder %v713_v52, 8.507059e+37 }
 0x9c2   :  { %v766_v24 = vadd.f32 %v1510_v20, %v765_v23 }
 0x9c4   :  { %v770_v27 = vsel %vm769_vm4, %v1510_v20, %v766_v24 }
 0x9c5   :  { %v775_v30 = vsel %vm772_vm5, %v774_v28, %v770_v27  ;;  %v1514_v44 = vpop.eup %1513 }
 0x9c6   :  { %v705_v46 = vmul.f32 %v1514_v44, %v703_v43  ;;  %vm710_vm6 = vweird.f32 %v1514_v44  ;;  %v778_v60 = vmul.f32 %v775_v30, %v1880_v34 }
 0x9c7   :  { %vm711_vm8 = vmor %vm709_vm7, %vm710_vm6 }
 0x9c8   :  { %v706_v48 = vsub.f32 1.0, %v705_v46 }
 0x9ca   :  { %v707_v49 = vmul.f32 %v1514_v44, %v706_v48 }
 0x9cc   :  { %v708_v50 = vadd.f32 %v1514_v44, %v707_v49 }
 0x9ce   :  { %v712_v55 = vsel %vm711_vm8, %v1514_v44, %v708_v50 }
 0x9cf   :  { %v717_v58 = vsel %vm714_vm9, %v716_v56, %v712_v55 }
 0x9d0   :  { %v720_v63 = vmul.f32 %v717_v58, %v1885_v59 }
 0x9f2   :  { %v781_v29 = vpop.permute.xlu0 %780 }
 0x9f3   :  { %v783_v31 = vmul.f32 %v781_v29, %v775_v30 }
 0x9f5   :  { %785 = vrot.lane.b32.xlu2 %v783_v31, %s1583_s23 }
 0xa24   :  { %v723_v57 = vpop.permute.xlu1 %722 }
 0xa25   :  { %v725_v47 = vmul.f32 %v723_v57, %v717_v58 }
 0xa27   :  { %727 = vrot.lane.b32.xlu0 %v725_v47, %s1583_s23 }
 0xa4f   :  { %v786_v61 = vpop.permute.xlu2 %785 }
 0xa50   :  { %v1917_v33 = vadd.f32 %v786_v61, %v778_v60 }
 0xa52   :  { %1515 = vtanh.f32 %v1917_v33 }
 0xa58   :  { %v1516_v62 = vpop.eup %1515 }
 0xa59   :  { %791 = vrot.lane.b32.xlu1 %v1516_v62, %s1582_s20 }
 0xa99   :  { %v728_v54 = vpop.permute.xlu0 %727 }
 0xa9a   :  { %v1922_v1 = vadd.f32 %v728_v54, %v720_v63  ;;  %v69_v54 = vld [vmem:[%s2081_s0 + $0x30] sm:$0xff] }
 0xa9b   :  { %1396 = vmatmul.msk.f32.gmra.mxu0 %vm77_vm0, %v69_v54 }
 0xa9c   :  { %1517 = vtanh.f32 %v1922_v1 }
 0xaa2   :  { %v1518_v3 = vpop.eup %1517 }
 0xaa3   :  { %733 = vrot.lane.b32.xlu2 %v1518_v3, %s1582_s20 }
 0xacb   :  { %v792_v4 = vpop.permute.xlu1 %791 }
 0xacc   :  { %v794_v34 = vmul.f32 %v792_v4, %v775_v30 }
 0xace   :  { %796 = vrot.lane.b32.xlu0 %v794_v34, %s1583_s23  ;;  %v1575_v34 = vld [vmem:[%s2085_s6 + $0x18] sm:$0xff] }
 0xafd   :  { %v734_v9 = vpop.permute.xlu2 %733 }
 0xafe   :  { %v736_v59 = vmul.f32 %v734_v9, %v717_v58 }
 0xb00   :  { %821 = vrot.lane.b32.xlu1 %v736_v59, %s1583_s23  ;;  %v1577_v59 = vld [vmem:[%s2079_s5 + $0x38] sm:$0xff] }
 0xb40   :  { %v797_v10 = vpop.permute.xlu0 %796 }
 0xb41   :  { %1420 = vmatmul.msk.f32.vlgmr.msra.gmra.mxu2 %vm143_vm1, %v797_v10  ;;  %1423 = vmatmul.msk.f32.vlgmr.msrb.gmra.mxu1 %vm143_vm1, %v797_v10  ;;  %v1578_v10 = vld [vmem:[%s2079_s5 + $0x30] sm:$0xff] }
 0xb42   :  { %1104 = vmatpush.msra.mxu2 %v1715_v35  ;;  %1187 = vmatpush.msrb.mxu1 %v1653_v0  ;;  %v134_v0 = vpop.f32.mrf.mxu0 }
 0xb44   :  { %1105 = vmatpush.msra.mxu2 %v1720_v36  ;;  %1188 = vmatpush.msrb.mxu1 %v1661_v2  ;;  %v135_v2 = vadd.f32 %v1699_v8, %v134_v0 }
 0xb46   :  { %1106 = vmatpush.msra.mxu2 %v1740_v40  ;;  %1189 = vmatpush.msrb.mxu1 %v1673_v5 }
 0xb48   :  { %1107 = vmatpush.msra.mxu2 %v1753_v42  ;;  %1190 = vmatpush.msrb.mxu1 %v1680_v6 }
 0xb72   :  { %v822_v11 = vpop.permute.xlu1 %821 }
 0xb73   :  { %1421 = vmatmul.msk.f32.vlgmr.msra.gmra.mxu3 %vm143_vm1, %v822_v11  ;;  %v1579_v11 = vld [vmem:[%s2079_s5 + $0x28] sm:$0xff] }
 0xb74   :  { %1129 = vmatpush.msra.mxu3 %v1725_v37 }
 0xb76   :  { %1130 = vmatpush.msra.mxu3 %v1732_v38 }
 0xb78   :  { %1131 = vmatpush.msra.mxu3 %v1746_v41 }
 0xb7a   :  { %1132 = vmatpush.msra.mxu3 %v1766_v45 }
 0xbbe   :  { %v900_v35 = vpop.f32.mrf.mxu1 }
 0xbbf   :  { %v903_v5 = vadd.f32 %v900_v35, %v135_v2 }
 0xbc1   :  { %1519 = vtanh.f32 %v903_v5  ;;  %v1424_v12 = vmul.f32 -1.442695, %v903_v5 }
 0xbc3   :  { %1521 = vpow2.f32 %v1424_v12 }
 0xbc4   :  { %v817_v6 = vpop.f32.mrf.mxu2 }
 0xbc5   :  { %v818_v13 = vadd.f32 %v1799_v53, %v817_v6 }
 0xbc7   :  { %v1520_v36 = vpop.eup %1519 }
 0xbc8   :  { %926 = vrot.lane.b32.xlu2 %v1520_v36, %s1582_s20 }
 0xbc9   :  { %v1522_v38 = vpop.eup %1521 }
 0xbca   :  { %v907_v15 = vadd.f32 1.0, %v1522_v38 }
 0xbcc   :  { %v919_v20 = vand.u32 2147483648, %v907_v15  ;;  %vm913_vm11 = vweird.f32 %v907_v15  ;;  %v917_v21 = vand.u32 2147483647, %v907_v15 }
 0xbce   :  { %v920_v23 = vor.u32 1.1754944e-38, %v919_v20  ;;  %vm918_vm13 = vcmp.eq.f32.partialorder %v917_v21, 8.507059e+37 }
 0xbf6   :  { %v842_v37 = vpop.f32.mrf.mxu3 }
 0xbf7   :  { %v845_v14 = vadd.f32 %v842_v37, %v818_v13 }
 0xbf9   :  { %1523 = vtanh.f32 %v845_v14  ;;  %v1422_v27 = vmul.f32 -1.442695, %v845_v14 }
 0xbfa   :  { %1525 = vrcp.f32 %v907_v15 }
 0xbfb   :  { %1527 = vpow2.f32 %v1422_v27 }
 0xbff   :  { %v1524_v41 = vpop.eup %1523 }
 0xc00   :  { %868 = vrot.lane.b32.xlu0 %v1524_v41, %s1582_s20  ;;  %v1526_v8 = vpop.eup %1525 }
 0xc01   :  { %v909_v16 = vmul.f32 %v1526_v8, %v907_v15  ;;  %vm914_vm10 = vweird.f32 %v1526_v8  ;;  %v1528_v28 = vpop.eup %1527 }
 0xc02   :  { %vm915_vm12 = vmor %vm913_vm11, %vm914_vm10  ;;  %v849_v29 = vadd.f32 1.0, %v1528_v28 }
 0xc03   :  { %v910_v17 = vsub.f32 1.0, %v909_v16 }
 0xc04   :  { %1529 = vrcp.f32 %v849_v29  ;;  %v861_v44 = vand.u32 2147483648, %v849_v29  ;;  %vm855_vm15 = vweird.f32 %v849_v29  ;;  %v859_v46 = vand.u32 2147483647, %v849_v29 }
 0xc05   :  { %v911_v18 = vmul.f32 %v1526_v8, %v910_v17 }
 0xc06   :  { %v862_v49 = vor.u32 1.1754944e-38, %v861_v44  ;;  %vm860_vm3 = vcmp.eq.f32.partialorder %v859_v46, 8.507059e+37 }
 0xc07   :  { %v912_v19 = vadd.f32 %v1526_v8, %v911_v18 }
 0xc09   :  { %v916_v22 = vsel %vm915_vm12, %v1526_v8, %v912_v19 }
 0xc0a   :  { %v921_v24 = vsel %vm918_vm13, %v920_v23, %v916_v22  ;;  %v1530_v30 = vpop.eup %1529 }
 0xc0b   :  { %v851_v31 = vmul.f32 %v1530_v30, %v849_v29  ;;  %vm856_vm14 = vweird.f32 %v1530_v30  ;;  %v924_v55 = vmul.f32 %v921_v24, %v1917_v33 }
 0xc0c   :  { %vm857_vm2 = vmor %vm855_vm15, %vm856_vm14 }
 0xc0d   :  { %v852_v32 = vsub.f32 1.0, %v851_v31 }
 0xc0f   :  { %v853_v39 = vmul.f32 %v1530_v30, %v852_v32 }
 0xc11   :  { %v854_v43 = vadd.f32 %v1530_v30, %v853_v39 }
 0xc13   :  { %v858_v48 = vsel %vm857_vm2, %v1530_v30, %v854_v43 }
 0xc14   :  { %v863_v51 = vsel %vm860_vm3, %v862_v49, %v858_v48 }
 0xc15   :  { %v866_v47 = vmul.f32 %v863_v51, %v1922_v1 }
 0xc22   :  { %v927_v25 = vpop.permute.xlu2 %926 }
 0xc23   :  { %v929_v26 = vmul.f32 %v927_v25, %v921_v24 }
 0xc25   :  { %931 = vrot.lane.b32.xlu1 %v929_v26, %s1583_s23 }
 0xc72   :  { %v869_v50 = vpop.permute.xlu0 %868 }
 0xc73   :  { %v871_v52 = vmul.f32 %v869_v50, %v863_v51 }
 0xc75   :  { %873 = vrot.lane.b32.xlu2 %v871_v52, %s1583_s23 }
 0xc97   :  { %v932_v56 = vpop.permute.xlu1 %931 }
 0xc98   :  { %v1954_v57 = vadd.f32 %v932_v56, %v924_v55 }
 0xc9a   :  { %1531 = vtanh.f32 %v1954_v57 }
 0xca0   :  { %v1532_v58 = vpop.eup %1531 }
 0xca1   :  { %937 = vrot.lane.b32.xlu0 %v1532_v58, %s1582_s20 }
 0xccf   :  { %v874_v60 = vpop.permute.xlu2 %873 }
 0xcd0   :  { %v1959_v61 = vadd.f32 %v874_v60, %v866_v47 }
 0xcd2   :  { %1533 = vtanh.f32 %v1959_v61 }
 0xcd8   :  { %v1534_v62 = vpop.eup %1533 }
 0xcd9   :  { %879 = vrot.lane.b32.xlu1 %v1534_v62, %s1582_s20 }
 0xd13   :  { %v938_v63 = vpop.permute.xlu0 %937 }
 0xd14   :  { %v940_v33 = vmul.f32 %v938_v63, %v921_v24  ;;  %v70_v63 = vld [vmem:[%s2081_s0 + $0x38] sm:$0xff] }
 0xd15   :  { %1397 = vmatmul.msk.f32.gmra.mxu0 %vm77_vm0, %v70_v63 }
 0xd16   :  { %942 = vrot.lane.b32.xlu2 %v940_v33, %s1583_s23 }
 0xd4b   :  { %v880_v3 = vpop.permute.xlu1 %879 }
 0xd4c   :  { %v882_v1 = vmul.f32 %v880_v3, %v863_v51 }
 0xd4e   :  { %967 = vrot.lane.b32.xlu0 %v882_v1, %s1583_s23 }
 0xd70   :  { %v943_v4 = vpop.permute.xlu2 %942 }
 0xd71   :  { %1425 = vmatmul.msk.f32.vlgmr.msrb.gmra.mxu2 %vm143_vm1, %v943_v4  ;;  %1428 = vmatmul.msk.f32.vlgmr.msra.gmra.mxu1 %vm143_vm1, %v943_v4 }
 0xd72   :  { %1250 = vmatpush.msrb.mxu2 %v1575_v34 }
 0xd74   :  { %1251 = vmatpush.msrb.mxu2 %v1576_v7 }
 0xd76   :  { %1252 = vmatpush.msrb.mxu2 %v1740_v40  ;;  %v137_v40 = vpop.f32.mrf.mxu0 }
 0xd78   :  { %1253 = vmatpush.msrb.mxu2 %v1753_v42  ;;  %v1993_v42 = vld [vmem:[%s2082_s4] ss:$0 sm:$0xff] }
 0xd79   :  { %v138_v0 = vadd.f32 %v1993_v42, %v137_v40 }
 0xd92   :  { %v140_v1 = vpop.f32.mrf.mxu0 }
 0xd93   :  { %v141_v4 = vadd.f32 %v1993_v42, %v140_v1 }
 0xdc0   :  { %v968_v9 = vpop.permute.xlu0 %967 }
 0xdc1   :  { %1426 = vmatmul.msk.f32.vlgmr.msrb.gmra.mxu3 %vm143_vm1, %v968_v9 }
 0xdc2   :  { %1275 = vmatpush.msrb.mxu3 %v1577_v59 }
 0xdc4   :  { %1276 = vmatpush.msrb.mxu3 %v1578_v10  ;;  %v2025_v10 = vld [vmem:[%s2086_s7] ss:$0 sm:$0xff] }
 0xdc6   :  { %1277 = vmatpush.msrb.mxu3 %v1579_v11 }
 0xdc8   :  { %1278 = vmatpush.msrb.mxu3 %v1766_v45 }
 0xdee   :  { %v1046_v2 = vpop.f32.mrf.mxu1 }
 0xdef   :  { %v1049_v35 = vadd.f32 %v1046_v2, %v138_v0 }
 0xdf1   :  { %1535 = vtanh.f32 %v1049_v35  ;;  %v1429_v36 = vmul.f32 -1.442695, %v1049_v35 }
 0xdf3   :  { %1537 = vpow2.f32 %v1429_v36 }
 0xdf4   :  { %v963_v6 = vpop.f32.mrf.mxu2 }
 0xdf5   :  { %v964_v12 = vadd.f32 %v1799_v53, %v963_v6 }
 0xdf7   :  { %v1536_v5 = vpop.eup %1535 }
 0xdf8   :  { %1072 = vrot.lane.b32.xlu1 %v1536_v5, %s1582_s20 }
 0xdf9   :  { %v1538_v37 = vpop.eup %1537 }
 0xdfa   :  { %v1053_v14 = vadd.f32 1.0, %v1538_v37 }
 0xdfc   :  { %v1065_v18 = vand.u32 2147483648, %v1053_v14  ;;  %vm1059_vm5 = vweird.f32 %v1053_v14  ;;  %v1063_v19 = vand.u32 2147483647, %v1053_v14 }
 0xdfe   :  { %v1066_v20 = vor.u32 1.1754944e-38, %v1065_v18  ;;  %vm1064_vm7 = vcmp.eq.f32.partialorder %v1063_v19, 8.507059e+37 }
 0xe44   :  { %v988_v45 = vpop.f32.mrf.mxu3 }
 0xe45   :  { %v991_v13 = vadd.f32 %v988_v45, %v964_v12 }
 0xe47   :  { %1539 = vtanh.f32 %v991_v13  ;;  %v1427_v24 = vmul.f32 -1.442695, %v991_v13 }
 0xe48   :  { %1541 = vrcp.f32 %v1053_v14 }
 0xe49   :  { %1543 = vpow2.f32 %v1427_v24 }
 0xe4d   :  { %v1540_v38 = vpop.eup %1539 }
 0xe4e   :  { %1014 = vrot.lane.b32.xlu2 %v1540_v38, %s1582_s20  ;;  %v1542_v41 = vpop.eup %1541 }
 0xe4f   :  { %v1055_v15 = vmul.f32 %v1542_v41, %v1053_v14  ;;  %vm1060_vm4 = vweird.f32 %v1542_v41  ;;  %v1544_v25 = vpop.eup %1543 }
 0xe50   :  { %vm1061_vm6 = vmor %vm1059_vm5, %vm1060_vm4  ;;  %v995_v26 = vadd.f32 1.0, %v1544_v25 }
 0xe51   :  { %v1056_v8 = vsub.f32 1.0, %v1055_v15 }
 0xe52   :  { %1545 = vrcp.f32 %v995_v26  ;;  %v1007_v32 = vand.u32 2147483648, %v995_v26  ;;  %vm1001_vm9 = vweird.f32 %v995_v26  ;;  %v1005_v39 = vand.u32 2147483647, %v995_v26 }
 0xe53   :  { %v1057_v16 = vmul.f32 %v1542_v41, %v1056_v8 }
 0xe54   :  { %v1008_v44 = vor.u32 1.1754944e-38, %v1007_v32  ;;  %vm1006_vm11 = vcmp.eq.f32.partialorder %v1005_v39, 8.507059e+37 }
 0xe55   :  { %v1058_v17 = vadd.f32 %v1542_v41, %v1057_v16 }
 0xe57   :  { %v1062_v53 = vsel %vm1061_vm6, %v1542_v41, %v1058_v17 }
 0xe58   :  { %v1067_v22 = vsel %vm1064_vm7, %v1066_v20, %v1062_v53  ;;  %v1546_v27 = vpop.eup %1545 }
 0xe59   :  { %v997_v28 = vmul.f32 %v1546_v27, %v995_v26  ;;  %vm1002_vm8 = vweird.f32 %v1546_v27  ;;  %v1070_v50 = vmul.f32 %v1067_v22, %v1954_v57 }
 0xe5a   :  { %vm1003_vm10 = vmor %vm1001_vm9, %vm1002_vm8  ;;  %vm1370_vm9 = vcmask 7168  }
 0xe5b   :  { %v998_v29 = vsub.f32 1.0, %v997_v28 }
 0xe5d   :  { %v999_v30 = vmul.f32 %v1546_v27, %v998_v29 }
 0xe5f   :  { %v1000_v31 = vadd.f32 %v1546_v27, %v999_v30 }
 0xe61   :  { %v1004_v43 = vsel %vm1003_vm10, %v1546_v27, %v1000_v31 }
 0xe62   :  { %v1009_v48 = vsel %vm1006_vm11, %v1008_v44, %v1004_v43 }
 0xe63   :  { %v1012_v56 = vmul.f32 %v1009_v48, %v1959_v61 }
 0xe6a   :  { %v1073_v21 = vpop.permute.xlu1 %1072 }
 0xe6b   :  { %v1075_v23 = vmul.f32 %v1073_v21, %v1067_v22 }
 0xe6d   :  { %1077 = vrot.lane.b32.xlu0 %v1075_v23, %s1583_s23 }
 0xea8   :  { %v1015_v46 = vpop.permute.xlu2 %1014 }
 0xea9   :  { %v1017_v49 = vmul.f32 %v1015_v46, %v1009_v48 }
 0xeab   :  { %1019 = vrot.lane.b32.xlu1 %v1017_v49, %s1583_s23 }
 0xedf   :  { %v1078_v51 = vpop.permute.xlu0 %1077 }
 0xee0   :  { %v2002_v52 = vadd.f32 %v1078_v51, %v1070_v50 }
 0xee2   :  { %1547 = vtanh.f32 %v2002_v52 }
 0xee8   :  { %v1548_v55 = vpop.eup %1547 }
 0xee9   :  { %1083 = vrot.lane.b32.xlu2 %v1548_v55, %s1582_s20 }
 0xf1d   :  { %v1020_v58 = vpop.permute.xlu1 %1019 }
 0xf1e   :  { %v2007_v47 = vadd.f32 %v1020_v58, %v1012_v56 }
 0xf20   :  { %1549 = vtanh.f32 %v2007_v47 }
 0xf26   :  { %v1550_v60 = vpop.eup %1549 }
 0xf27   :  { %1025 = vrot.lane.b32.xlu0 %v1550_v60, %s1582_s20 }
 0xf43   :  { %v1084_v62 = vpop.permute.xlu2 %1083 }
 0xf44   :  { %v1086_v57 = vmul.f32 %v1084_v62, %v1067_v22 }
 0xf46   :  { %1088 = vrot.lane.b32.xlu1 %v1086_v57, %s1583_s23 }
 0xf99   :  { %v1026_v33 = vpop.permute.xlu0 %1025 }
 0xf9a   :  { %v1028_v61 = vmul.f32 %v1026_v33, %v1009_v48 }
 0xf9c   :  { %1113 = vrot.lane.b32.xlu2 %v1028_v61, %s1583_s23 }
 0xfb8   :  { %v1089_v54 = vpop.permute.xlu1 %1088 }
 0xfb9   :  { %1430 = vmatmul.msk.f32.vlgmr.msra.gmra.mxu2 %vm143_vm1, %v1089_v54  ;;  %1433 = vmatmul.msk.f32.vlgmr.msrb.gmra.mxu1 %vm143_vm1, %v1089_v54 }
 0xff6   :  { %v1114_v3 = vpop.permute.xlu2 %1113 }
 0xff7   :  { %1431 = vmatmul.msk.f32.vlgmr.msra.gmra.mxu3 %vm143_vm1, %v1114_v3 }
0x1036   :  { %v1192_v34 = vpop.f32.mrf.mxu1 }
0x1037   :  { %v1195_v7 = vadd.f32 %v1192_v34, %v141_v4 }
0x1039   :  { %1551 = vtanh.f32 %v1195_v7  ;;  %v1434_v42 = vmul.f32 -1.442695, %v1195_v7 }
0x103c   :  { %v1109_v59 = vpop.f32.mrf.mxu2 }
0x103d   :  { %v1110_v11 = vadd.f32 %v2025_v10, %v1109_v59 }
0x103f   :  { %v1552_v9 = vpop.eup %1551 }
0x1040   :  { %1218 = vrot.lane.b32.xlu0 %v1552_v9, %s1582_s20 }
0x107a   :  { %v1134_v40 = vpop.f32.mrf.mxu3 }
0x107b   :  { %v1137_v0 = vadd.f32 %v1134_v40, %v1110_v11 }
0x107d   :  { %1553 = vtanh.f32 %v1137_v0  ;;  %v1432_v17 = vmul.f32 -1.442695, %v1137_v0 }
0x107e   :  { %1555 = vpow2.f32 %v1434_v42 }
0x1083   :  { %v1554_v2 = vpop.eup %1553 }
0x1084   :  { %1160 = vrot.lane.b32.xlu1 %v1554_v2, %s1582_s20  ;;  %v1556_v35 = vpop.eup %1555 }
0x1085   :  { %v1199_v5 = vadd.f32 1.0, %v1556_v35 }
0x1087   :  { %1557 = vrcp.f32 %v1199_v5  ;;  %v1211_v37 = vand.u32 2147483648, %v1199_v5  ;;  %vm1205_vm12 = vweird.f32 %v1199_v5  ;;  %v1209_v14 = vand.u32 2147483647, %v1199_v5 }
0x1088   :  { %1559 = vpow2.f32 %v1432_v17 }
0x1089   :  { %v1212_v41 = vor.u32 1.1754944e-38, %v1211_v37  ;;  %vm1210_vm14 = vcmp.eq.f32.partialorder %v1209_v14, 8.507059e+37  ;;  %v1340_v37 = vld [vmem:[%s2089_s8] sm:$0xff] }
0x108d   :  { %v1558_v36 = vpop.eup %1557 }
0x108e   :  { %v1201_v6 = vmul.f32 %v1558_v36, %v1199_v5  ;;  %vm1206_vm0 = vweird.f32 %v1558_v36  ;;  %v1560_v18 = vpop.eup %1559 }
0x108f   :  { %vm1207_vm13 = vmor %vm1205_vm12, %vm1206_vm0  ;;  %v1141_v19 = vadd.f32 1.0, %v1560_v18 }
0x1090   :  { %v1202_v12 = vsub.f32 1.0, %v1201_v6 }
0x1091   :  { %1561 = vrcp.f32 %v1141_v19  ;;  %v1153_v24 = vand.u32 2147483648, %v1141_v19  ;;  %vm1147_vm2 = vweird.f32 %v1141_v19  ;;  %v1151_v25 = vand.u32 2147483647, %v1141_v19 }
0x1092   :  { %v1203_v45 = vmul.f32 %v1558_v36, %v1202_v12  ;;  %v1343_v12 = vld [vmem:[%s2089_s8 + $0x18] sm:$0xff] }
0x1093   :  { %v1154_v27 = vor.u32 1.1754944e-38, %v1153_v24  ;;  %vm1152_vm4 = vcmp.eq.f32.partialorder %v1151_v25, 8.507059e+37  ;;  %1362 = vmatpush.msrb.mxu0 %v1343_v12 }
0x1094   :  { %v1204_v13 = vadd.f32 %v1558_v36, %v1203_v45  ;;  %v1342_v45 = vld [vmem:[%s2089_s8 + $0x10] sm:$0xff] }
0x1095   :  { %1363 = vmatpush.msrb.mxu0 %v1342_v45 }
0x1096   :  { %v1208_v38 = vsel %vm1207_vm13, %v1558_v36, %v1204_v13  ;;  %v1341_v13 = vld [vmem:[%s2089_s8 + $0x8] sm:$0xff] }
0x1097   :  { %v1213_v15 = vsel %vm1210_vm14, %v1212_v41, %v1208_v38  ;;  %v1562_v53 = vpop.eup %1561  ;;  %1364 = vmatpush.msrb.mxu0 %v1341_v13 }
0x1098   :  { %v1143_v20 = vmul.f32 %v1562_v53, %v1141_v19  ;;  %vm1148_vm15 = vweird.f32 %v1562_v53  ;;  %v1216_v31 = vmul.f32 %v1213_v15, %v2002_v52 }
0x1099   :  { %vm1149_vm3 = vmor %vm1147_vm2, %vm1148_vm15  ;;  %1365 = vmatpush.msrb.mxu0 %v1340_v37 }
0x109a   :  { %v1144_v21 = vsub.f32 1.0, %v1143_v20 }
0x109c   :  { %v1145_v22 = vmul.f32 %v1562_v53, %v1144_v21 }
0x109e   :  { %v1146_v23 = vadd.f32 %v1562_v53, %v1145_v22 }
0x10a0   :  { %v1150_v26 = vsel %vm1149_vm3, %v1562_v53, %v1146_v23 }
0x10a1   :  { %v1155_v29 = vsel %vm1152_vm4, %v1154_v27, %v1150_v26 }
0x10a2   :  { %v1158_v44 = vmul.f32 %v1155_v29, %v2007_v47 }
0x10b2   :  { %v1219_v8 = vpop.permute.xlu0 %1218 }
0x10b3   :  { %v1221_v16 = vmul.f32 %v1219_v8, %v1213_v15 }
0x10b5   :  { %1223 = vrot.lane.b32.xlu2 %v1221_v16, %s1583_s23 }
0x10f6   :  { %v1161_v28 = vpop.permute.xlu1 %1160 }
0x10f7   :  { %v1163_v30 = vmul.f32 %v1161_v28, %v1155_v29 }
0x10f9   :  { %1165 = vrot.lane.b32.xlu0 %v1163_v30, %s1583_s23 }
0x110f   :  { %v1224_v32 = vpop.permute.xlu2 %1223 }
0x1110   :  { %v1226_v39 = vadd.f32 %v1224_v32, %v1216_v31 }
0x1112   :  { %1563 = vtanh.f32 %v1226_v39 }
0x1118   :  { %v1564_v43 = vpop.eup %1563 }
0x1119   :  { %1229 = vrot.lane.b32.xlu1 %v1564_v43, %s1582_s20 }
0x116b   :  { %v1166_v46 = vpop.permute.xlu0 %1165 }
0x116c   :  { %v1168_v48 = vadd.f32 %v1166_v46, %v1158_v44 }
0x116e   :  { %1565 = vtanh.f32 %v1168_v48 }
0x1174   :  { %v1566_v49 = vpop.eup %1565 }
0x1175   :  { %1171 = vrot.lane.b32.xlu2 %v1566_v49, %s1582_s20 }
0x118b   :  { %v1230_v50 = vpop.permute.xlu1 %1229 }
0x118c   :  { %v1232_v51 = vmul.f32 %v1230_v50, %v1213_v15  ;;  %v18_v15 = vstv %s2090_s9 }
0x118d   :  { %19 = vst [vmem:[#allocation2] sm:$0x1] %v18_v15 }
0x118e   :  { %1234 = vrot.lane.b32.xlu0 %v1232_v51, %s1583_s23 }
0x1194   :  { %v1446_v16 = vld [vmem:[#allocation2] ss:$0 sm:$0xff] }
0x11cf   :  { %v1172_v55 = vpop.permute.xlu2 %1171 }
0x11d0   :  { %v1174_v52 = vmul.f32 %v1172_v55, %v1155_v29 }
0x11d2   :  { %1259 = vrot.lane.b32.xlu1 %v1174_v52, %s1583_s23 }
0x1200   :  { %v1235_v56 = vpop.permute.xlu0 %1234 }
0x1201   :  { %1322 = vst.msk [vmem:[%s2087_s11] sm:$0xff] %vm143_vm1, %v1235_v56  ;;  %1435 = vmatmul.msk.f32.vlgmr.msrb.gmra.mxu2 %vm143_vm1, %v1235_v56 }
0x1244   :  { %v1260_v58 = vpop.permute.xlu1 %1259 }
0x1245   :  { %1436 = vmatmul.msk.f32.vlgmr.msrb.gmra.mxu3 %vm143_vm1, %v1260_v58 }
0x1284   :  { %v1255_v47 = vpop.f32.mrf.mxu2 }
0x1285   :  { %v1256_v60 = vadd.f32 %v2025_v10, %v1255_v47 }
0x12c8   :  { %v1280_v62 = vpop.f32.mrf.mxu3 }
0x12c9   :  { %v1283_v57 = vadd.f32 %v1280_v62, %v1256_v60 }
0x12cb   :  { %1567 = vtanh.f32 %v1283_v57  ;;  %v1437_v33 = vmul.f32 -1.442695, %v1283_v57 }
0x12cd   :  { %1569 = vpow2.f32 %v1437_v33 }
0x12d1   :  { %v1568_v63 = vpop.eup %1567 }
0x12d2   :  { %1306 = vrot.lane.b32.xlu2 %v1568_v63, %s1582_s20 }
0x12d3   :  { %v1570_v61 = vpop.eup %1569 }
0x12d4   :  { %v1287_v54 = vadd.f32 1.0, %v1570_v61 }
0x12d6   :  { %1571 = vrcp.f32 %v1287_v54  ;;  %v1299_v9 = vand.u32 2147483648, %v1287_v54  ;;  %vm1293_vm6 = vweird.f32 %v1287_v54  ;;  %v1297_v59 = vand.u32 2147483647, %v1287_v54 }
0x12d8   :  { %v1300_v11 = vor.u32 1.1754944e-38, %v1299_v9  ;;  %vm1298_vm8 = vcmp.eq.f32.partialorder %v1297_v59, 8.507059e+37 }
0x12dc   :  { %v1572_v3 = vpop.eup %1571 }
0x12dd   :  { %v1289_v1 = vmul.f32 %v1572_v3, %v1287_v54  ;;  %vm1294_vm5 = vweird.f32 %v1572_v3 }
0x12de   :  { %vm1295_vm7 = vmor %vm1293_vm6, %vm1294_vm5 }
0x12df   :  { %v1290_v4 = vsub.f32 1.0, %v1289_v1 }
0x12e1   :  { %v1291_v34 = vmul.f32 %v1572_v3, %v1290_v4 }
0x12e3   :  { %v1292_v7 = vadd.f32 %v1572_v3, %v1291_v34 }
0x12e5   :  { %v1296_v10 = vsel %vm1295_vm7, %v1572_v3, %v1292_v7 }
0x12e6   :  { %v1301_v0 = vsel %vm1298_vm8, %v1300_v11, %v1296_v10 }
0x12e7   :  { %v1304_v42 = vmul.f32 %v1301_v0, %v1168_v48 }
0x132c   :  { %v1307_v40 = vpop.permute.xlu2 %1306 }
0x132d   :  { %v1309_v2 = vmul.f32 %v1307_v40, %v1301_v0 }
0x132f   :  { %1311 = vrot.lane.b32.xlu0 %v1309_v2, %s1583_s23 }
0x1337   :  { %1324 = vrot.lane.b32.xlu0 %v1226_v39, %s1584_s15 }
0x13a1   :  { %v1312_v35 = vpop.permute.xlu0 %1311 }
0x13a2   :  { %v1314_v5 = vadd.f32 %v1312_v35, %v1304_v42 }
0x13a4   :  { %1573 = vtanh.f32 %v1314_v5 }
0x13a9   :  { %v1325_v36 = vpop.permute.xlu0 %1324 }
0x13aa   :  { %v1574_v6 = vpop.eup %1573  ;;  %1327 = vst.msk [vmem:[%s2088_s12] sm:$0xff] %vm143_vm1, %v1325_v36 }
0x13ab   :  { %1317 = vrot.lane.b32.xlu1 %v1574_v6, %s1582_s20 }
0x13b3   :  { %1335 = vrot.lane.b32.xlu1 %v1314_v5, %s1584_s15 }
0x141d   :  { %v1318_v14 = vpop.permute.xlu1 %1317 }
0x141e   :  { %v1320_v38 = vmul.f32 %v1318_v14, %v1301_v0 }
0x1420   :  { %1329 = vrot.lane.b32.xlu2 %v1320_v38, %s1583_s23 }
0x1425   :  { %v1336_v41 = vpop.permute.xlu1 %1335 }
0x1426   :  { %1439 = vst.msk [vmem:[%s2088_s12 + $0x8] sm:$0xff] %vm143_vm1, %v1336_v41 }
0x147a   :  { %v1330_v8 = vpop.permute.xlu2 %1329 }
0x147b   :  { %1438 = vst.msk [vmem:[%s2087_s11 + $0x8] sm:$0xff] %vm143_vm1, %v1330_v8  ;;  %1440 = vmatmul.msk.f32.vlgmr.msrb.gmra.mxu0 %vm143_vm1, %v1330_v8 }
0x14f8   :  { %v1367_v17 = vpop.f32.mrf.mxu0 }
0x14f9   :  { %v1368_v18 = vadd.f32 %v1446_v16, %v1367_v17 }
0x14fb   :  { %1371 = vst.msk [vmem:[%s2091_s10] sm:$0xff] %vm1370_vm9, %v1368_v18 }

</bundles_post_ra>
